<compile_context>
chip_gen: v7x
topology: tpu7x:2x2x1
jax: 0.10.0
libtpu: 0.0.40
codegen_flags: <defaults>
</compile_context>

<pallas_src>
import functools

import jax
import jax.numpy as jnp
from jax import lax
from jax.experimental import pallas as pl
from jax.experimental.pallas import tpu as pltpu


# ---------------------------------------------------------------------------
# Per-generation defaults.
# ---------------------------------------------------------------------------

def _tpu_defaults():
    vmem_cap = 64 * 1024 * 1024          # conservative (v7x) if detection fails
    try:
        info = pltpu.get_tpu_info()
        vmem_cap = int(getattr(info, "vmem_capacity_bytes", vmem_cap))
    except Exception:
        pass
    kind = ""
    try:
        kind = jax.devices()[0].device_kind.lower()
    except Exception:
        pass
    num_splits = 2 if "v7" in kind else 1   # 2-way stats split only pays on 2-TC chips
    budget = (vmem_cap * 3) // 4
    target_block = max(1 << 20, min(12 << 20, budget // 8))
    return budget, target_block, num_splits


# ---------------------------------------------------------------------------
# In-kernel helpers.
# ---------------------------------------------------------------------------

def _sum_all3(a):
    """[B, T, HW] -> [1, 1, 1] sum (stays rank-3, TPU-friendly reductions)."""
    s = jnp.sum(a, axis=2, keepdims=True)
    s = jnp.sum(s, axis=1, keepdims=True)
    return jnp.sum(s, axis=0, keepdims=True)


# ---------------------------------------------------------------------------
# Pallas kernels.
#   Two-pass path (large activations):
#     pass 1: per-channel masked sums over x viewed as [n, b*t, hw]
#     pass 2: y = x*scale + bias on unmasked positions, emitted as [b, n, t, hw]
#   Fused path (fits VMEM): stats + normalize in one call, x read once.
# ---------------------------------------------------------------------------

def _stats_body(x_ref, nm_ref, sum_ref, ssq_ref, *, total_rows, rows_per_tile,
                tiles_per_split):
    split = pl.program_id(0)
    step = pl.program_id(1)

    @pl.when(step == 0)
    def _():
        sum_ref[...] = jnp.zeros_like(sum_ref)
        ssq_ref[...] = jnp.zeros_like(ssq_ref)

    # Global row ids of this tile (unclamped).  Tiles past the end of the row
    # axis (cdiv padding / idle split) contribute nothing; garbage read in any
    # out-of-bounds region is removed by the select (NaN-safe).
    tile_idx = split * tiles_per_split + step
    row_ids = (lax.broadcasted_iota(jnp.int32, (rows_per_tile, 1), 0)
               + tile_idx * rows_per_tile)
    keep = row_ids < total_rows                              # [tb, 1]
    if nm_ref is not None:                                   # strict masked path
        keep = jnp.logical_and(keep, nm_ref[...] > 0.0)      # [tb, hw]

    x = x_ref[...].astype(jnp.float32)                       # [n, tb, hw]
    xs = jnp.where(keep[None], x, 0.0)
    s1 = jnp.sum(jnp.sum(xs, axis=2), axis=1, keepdims=True)        # [n, 1]
    s2 = jnp.sum(jnp.sum(xs * xs, axis=2), axis=1, keepdims=True)   # [n, 1]
    sum_ref[...] += s1[None]
    ssq_ref[...] += s2[None]


def _stats_kernel_prezeroed(x_ref, sum_ref, ssq_ref, **kw):
    _stats_body(x_ref, None, sum_ref, ssq_ref, **kw)


def _stats_kernel_masked(x_ref, nm_ref, sum_ref, ssq_ref, **kw):
    _stats_body(x_ref, nm_ref, sum_ref, ssq_ref, **kw)


def _norm_kernel(sb_ref, x_ref, nm_ref, o_ref, *, nchan, prezeroed):
    """Normalize + relayout.

    x_ref:  [n, b_tile, t, hw]    nm_ref: [b_tile, 1, hw]
    o_ref:  [b_tile, n, t, hw]    sb_ref: SMEM [2, n]  (scale, bias)
    """
    nm = nm_ref[...].astype(jnp.float32)                     # [b_tile, 1, hw]
    for j in range(nchan):                                   # nchan small & static
        xj = x_ref[j, :, :, :].astype(jnp.float32)           # [b_tile, t, hw]
        yj = xj * sb_ref[0, j] + sb_ref[1, j]
        if prezeroed:
            yj = yj * nm          # masked x == 0  ->  pass-through value is 0
        else:
            yj = jnp.where(nm > 0.0, yj, xj)
        o_ref[:, j, :, :] = yj.astype(o_ref.dtype)


def _fused_bn_kernel(gbc_ref, x_ref, nm_ref, o_ref, *, eps, nchan, prezeroed):
    """Single-pass masked BN (x resident in VMEM).

    x_ref: [n, b, t, hw]   nm_ref: [b, 1, hw]   o_ref: [b, n, t, hw]
    gbc_ref: SMEM [3, n] rows = (gamma, beta, unmasked-position count).
    """
    nm = nm_ref[...].astype(jnp.float32)                     # [b, 1, hw]
    cnt = gbc_ref[2, 0]
    for j in range(nchan):
        xj = x_ref[j, :, :, :].astype(jnp.float32)           # [b, t, hw]
        xs = xj if prezeroed else xj * nm
        mean = _sum_all3(xs) / cnt                           # [1, 1, 1]
        xc = xj - mean
        var = _sum_all3(xc * xc * nm) / cnt                  # centered, masked
        scale = gbc_ref[0, j] / jnp.sqrt(var + eps)
        bias = gbc_ref[1, j] - mean * scale
        yj = xj * scale + bias
        if prezeroed:
            yj = yj * nm
        else:
            yj = jnp.where(nm > 0.0, yj, xj)
        o_ref[:, j, :, :] = yj.astype(o_ref.dtype)


# ---------------------------------------------------------------------------
# Masked BatchNorm wrapper.
#   x:        [n, b, t, hw]  (masked positions must be 0 when x_prezeroed=True)
#   not_mask: [b, 1, hw]     (1.0 = position participates)
#   returns   [b, n, t, hw]  so that reshape to [(b n), t, hw] is free.
# ---------------------------------------------------------------------------

def masked_batch_norm(x, not_mask, gamma, beta, *, eps=1e-5, count=None,
                      x_prezeroed=True, out_dtype=None, use_fused=None,
                      num_splits=None, target_block_bytes=None,
                      vmem_limit_bytes=None):
    n, b, t, hw = x.shape
    not_mask = not_mask.reshape(b, 1, hw)
    out_dtype = x.dtype if out_dtype is None else out_dtype
    out_itemsize = jnp.dtype(out_dtype).itemsize

    budget, def_target, def_splits = _tpu_defaults()
    vmem_limit_bytes = budget if vmem_limit_bytes is None else vmem_limit_bytes
    target_block_bytes = def_target if target_block_bytes is None else target_block_bytes
    num_splits = def_splits if num_splits is None else num_splits

    if count is None:
        count = jnp.sum(not_mask.astype(jnp.float32)) * t
    count = jnp.maximum(jnp.asarray(count, jnp.float32), 1.0)   # all-masked guard

    x_bytes = x.size * x.dtype.itemsize
    out_bytes = x.size * out_itemsize
    # Conservative fused-path VMEM need: (double-buffered) x + y + f32 temps.
    fused_need = 2 * x_bytes + 2 * out_bytes + 6 * (x.size // max(n, 1)) * 4 + (1 << 20)
    if use_fused is None:
        use_fused = fused_need <= vmem_limit_bytes

    # ------------------------- fused single pass ---------------------------
    if use_fused:
        gbc = jnp.stack([gamma.astype(jnp.float32), beta.astype(jnp.float32),
                         jnp.broadcast_to(count, (n,))])          # [3, n] -> SMEM
        return pl.pallas_call(
            functools.partial(_fused_bn_kernel, eps=eps, nchan=n,
                              prezeroed=x_prezeroed),
            out_shape=jax.ShapeDtypeStruct((b, n, t, hw), out_dtype),
            grid=(1,),
            in_specs=[pl.BlockSpec(memory_space=pltpu.MemorySpace.SMEM),
                      pl.BlockSpec((n, b, t, hw), lambda i: (0, 0, 0, 0)),
                      pl.BlockSpec((b, 1, hw), lambda i: (0, 0, 0))],
            out_specs=pl.BlockSpec((b, n, t, hw), lambda i: (0, 0, 0, 0)),
            compiler_params=pltpu.CompilerParams(
                dimension_semantics=("arbitrary",),
                vmem_limit_bytes=vmem_limit_bytes),
        )(gbc, x, not_mask)

    # ------------------ pass 1: per-channel masked statistics --------------
    rows = b * t
    x_flat = x.reshape(n, rows, hw)                       # free view of the same buffer
    per_row = n * hw * x.dtype.itemsize
    tb = max(1, target_block_bytes // per_row)
    tb = rows if tb >= rows else min(max(8, (tb // 8) * 8), rows)
    num_tiles = pl.cdiv(rows, tb)
    num_splits = max(1, min(num_splits, num_tiles))
    tiles_per_split = pl.cdiv(num_tiles, num_splits)

    def tile_idx(split, step):
        # Clamp so the DMA never targets a fully out-of-range block; duplicated
        # tiles are neutralised by the in-kernel row-validity mask.
        return jnp.minimum(split * tiles_per_split + step, num_tiles - 1)

    stats_kwargs = dict(total_rows=rows, rows_per_tile=tb,
                        tiles_per_split=tiles_per_split)
    if x_prezeroed:
        # Masked x is exactly 0 -> mask stream not needed at all for the sums.
        stats_kernel = functools.partial(_stats_kernel_prezeroed, **stats_kwargs)
        stats_in_specs = [pl.BlockSpec((n, tb, hw),
                                       lambda c, i: (0, tile_idx(c, i), 0))]
        stats_args = (x_flat,)
    else:
        # Strict masked semantics: materialise the row-broadcast mask once.
        nm_rows = jnp.broadcast_to(not_mask.reshape(b, 1, hw),
                                   (b, t, hw)).reshape(rows, hw)
        stats_kernel = functools.partial(_stats_kernel_masked, **stats_kwargs)
        stats_in_specs = [pl.BlockSpec((n, tb, hw),
                                       lambda c, i: (0, tile_idx(c, i), 0)),
                          pl.BlockSpec((tb, hw),
                                       lambda c, i: (tile_idx(c, i), 0))]
        stats_args = (x_flat, nm_rows)

    sum_p, ssq_p = pl.pallas_call(
        stats_kernel,
        out_shape=(jax.ShapeDtypeStruct((num_splits, n, 1), jnp.float32),
                   jax.ShapeDtypeStruct((num_splits, n, 1), jnp.float32)),
        grid=(num_splits, tiles_per_split),
        in_specs=stats_in_specs,
        out_specs=(pl.BlockSpec((1, n, 1), lambda c, i: (c, 0, 0)),
                   pl.BlockSpec((1, n, 1), lambda c, i: (c, 0, 0))),
        compiler_params=pltpu.CompilerParams(
            dimension_semantics=("parallel", "arbitrary"),
            vmem_limit_bytes=vmem_limit_bytes),
    )(*stats_args)

    # Tiny glue: combine split partials, fold stats + affine into scale/bias.
    sums = jnp.sum(sum_p, axis=0)[:, 0]
    ssqs = jnp.sum(ssq_p, axis=0)[:, 0]
    mean = sums / count
    var = jnp.maximum(ssqs / count - mean * mean, 0.0)        # biased variance
    scale = gamma.astype(jnp.float32) / jnp.sqrt(var + eps)
    bias = beta.astype(jnp.float32) - mean * scale
    sb = jnp.stack([scale, bias])                             # [2, n] -> SMEM

    # -------- pass 2: normalize + relayout to [b, n, t, hw] (lane-dense) ----
    per_b = n * t * hw * max(x.dtype.itemsize, out_itemsize)
    b_tile = max(1, min(b, target_block_bytes // per_b))
    num_b_tiles = pl.cdiv(b, b_tile)

    y = pl.pallas_call(
        functools.partial(_norm_kernel, nchan=n, prezeroed=x_prezeroed),
        out_shape=jax.ShapeDtypeStruct((b, n, t, hw), out_dtype),
        grid=(num_b_tiles,),
        in_specs=[pl.BlockSpec(memory_space=pltpu.MemorySpace.SMEM),
                  pl.BlockSpec((n, b_tile, t, hw), lambda i: (0, i, 0, 0)),
                  pl.BlockSpec((b_tile, 1, hw), lambda i: (i, 0, 0))],
        out_specs=pl.BlockSpec((b_tile, n, t, hw), lambda i: (i, 0, 0, 0)),
        compiler_params=pltpu.CompilerParams(
            dimension_semantics=("parallel",),
            vmem_limit_bytes=vmem_limit_bytes),
    )(sb, x, not_mask)
    return y


# ---------------------------------------------------------------------------
# Full MAAM forward.
# ---------------------------------------------------------------------------

def maam_forward(prev_attn, curr_attn, key_padding_mask, params, *,
                 nhead, h, cross_coverage=True, self_coverage=True, eps=1e-5,
                 bn_dtype=None):
    """prev_attn/curr_attn: [(b*nhead), t, l]; key_padding_mask: [b, l] (True=pad)."""
    assert cross_coverage or self_coverage
    bn_, t, l = curr_attn.shape
    b = bn_ // nhead
    w = l // h

    curr = curr_attn.reshape(b, nhead, t, l)
    prev = prev_attn.reshape(b, nhead, t, l)
    attns = []
    if cross_coverage:
        attns.append(prev)
    if self_coverage:
        attns.append(curr)
    attns = jnp.concatenate(attns, axis=1)                        # [b, in_chs, t, l]
    attns = jnp.cumsum(attns, axis=2) - attns                     # exclusive cumsum over t
    in_chs = attns.shape[1]
    attns = attns.transpose(0, 2, 1, 3).reshape(b * t, in_chs, h, w)

    mask_bt = jnp.broadcast_to(key_padding_mask.reshape(b, 1, 1, h, w),
                               (b, t, 1, h, w)).reshape(b * t, 1, h, w)
    not_mask_b = jnp.logical_not(key_padding_mask).astype(jnp.float32).reshape(b, 1, h * w)
    # Exact unmasked-position count (int32 sum, then f32).
    count = (t * jnp.sum(jnp.logical_not(key_padding_mask).astype(jnp.int32))
             ).astype(jnp.float32)

    # TODO(synk): 5x5/11x11 convolutions, the cumsum over t, ReLU+mask and the 1x1
    # projections are left to XLA (lax.conv / einsum); only the masked BatchNorm
    # uses custom Pallas kernels.
    dn = ("NCHW", "OIHW", "NCHW")
    cov = lax.conv_general_dilated(attns, params["w_conv"], (1, 1), "SAME",
                                   dimension_numbers=dn)
    cov = jnp.where(mask_bt, 0.0, jax.nn.relu(cov + params["b_conv"][None, :, None, None]))
    cov2 = lax.conv_general_dilated(attns, params["w_conv2"], (1, 1), "SAME",
                                    dimension_numbers=dn)
    cov2 = jnp.where(mask_bt, 0.0, jax.nn.relu(cov2 + params["b_conv2"][None, :, None, None]))

    # 1x1 projections emitted channel-leading so the Pallas BN gets [n, b, t, hw]
    # (spatial on lanes) with no extra transpose around the kernels.
    proj = jnp.einsum("nc,bchw->nbhw", params["w_proj"], cov)
    proj2 = jnp.einsum("nc,bchw->nbhw", params["w_proj2"], cov2)
    x = (proj + proj2).reshape(nhead, b, t, h * w)
    if bn_dtype is not None:
        x = x.astype(bn_dtype)        # optional bf16 BN: halves BN HBM traffic

    # Pallas BN emits [b, nhead, t, hw] directly -> final reshape is free.
    y = masked_batch_norm(x, not_mask_b, params["gamma"], params["beta"],
                          eps=eps, count=count, x_prezeroed=True,
                          out_dtype=curr_attn.dtype)
    return y.reshape(b * nhead, t, h * w)


# ---------------------------------------------------------------------------
# Pure-JAX references (for verification).
# ---------------------------------------------------------------------------

def _reference_masked_bn(x, not_mask, gamma, beta, eps=1e-5):
    """x: [n, b, t, hw]; not_mask: [b, 1, hw]; returns [b, n, t, hw]."""
    n, b, t, hw = x.shape
    nm = not_mask.reshape(1, b, 1, hw)
    cnt = jnp.maximum(jnp.sum(nm) * t, 1.0)
    mean = jnp.sum(x * nm, axis=(1, 2, 3), keepdims=True) / cnt
    var = jnp.sum(((x - mean) ** 2) * nm, axis=(1, 2, 3), keepdims=True) / cnt
    y = (gamma[:, None, None, None] * (x - mean) / jnp.sqrt(var + eps)
         + beta[:, None, None, None])
    y = jnp.where(nm > 0, y, x)
    return jnp.transpose(y, (1, 0, 2, 3))


def _reference_maam(prev_attn, curr_attn, key_padding_mask, params, *,
                    nhead, h, cross_coverage=True, self_coverage=True, eps=1e-5):
    bn_, t, l = curr_attn.shape
    b = bn_ // nhead
    w = l // h
    curr = curr_attn.reshape(b, nhead, t, l)
    prev = prev_attn.reshape(b, nhead, t, l)
    attns = []
    if cross_coverage:
        attns.append(prev)
    if self_coverage:
        attns.append(curr)
    attns = jnp.concatenate(attns, axis=1)
    attns = jnp.cumsum(attns, axis=2) - attns
    in_chs = attns.shape[1]
    attns = attns.transpose(0, 2, 1, 3).reshape(b * t, in_chs, h, w)
    mask_bt = jnp.broadcast_to(key_padding_mask.reshape(b, 1, 1, h, w),
                               (b, t, 1, h, w)).reshape(b * t, 1, h, w)
    dn = ("NCHW", "OIHW", "NCHW")
    cov = lax.conv_general_dilated(attns, params["w_conv"], (1, 1), "SAME",
                                   dimension_numbers=dn)
    cov = jnp.where(mask_bt, 0.0, jax.nn.relu(cov + params["b_conv"][None, :, None, None]))
    cov = jnp.einsum("nc,bchw->bnhw", params["w_proj"], cov)
    cov2 = lax.conv_general_dilated(attns, params["w_conv2"], (1, 1), "SAME",
                                    dimension_numbers=dn)
    cov2 = jnp.where(mask_bt, 0.0, jax.nn.relu(cov2 + params["b_conv2"][None, :, None, None]))
    cov2 = jnp.einsum("nc,bchw->bnhw", params["w_proj2"], cov2)
    covs = cov + cov2                                             # [bt, n, h, w]

    nm = (~mask_bt).astype(jnp.float32)
    cnt = jnp.maximum(jnp.sum(nm), 1.0)
    mean = jnp.sum(covs * nm, axis=(0, 2, 3)) / cnt
    var = jnp.sum(((covs - mean[None, :, None, None]) ** 2) * nm, axis=(0, 2, 3)) / cnt
    yn = (params["gamma"][None, :, None, None]
          * (covs - mean[None, :, None, None]) / jnp.sqrt(var[None, :, None, None] + eps)
          + params["beta"][None, :, None, None])
    y = jnp.where(mask_bt, covs, yn)
    return y.reshape(b, t, nhead, h * w).transpose(0, 2, 1, 3).reshape(b * nhead, t, h * w)


if __name__ == "__main__":
    key = jax.random.PRNGKey(0)
    (k_prev, k_curr, k1, k2, k3, k4, k5, k6, k7, k8) = jax.random.split(key, 10)

    # ---- Standalone masked-BN checks (fused + tiled two-pass, both mask modes).
    nt, bt, tt, hwt = 3, 7, 8, 256
    nm_t = (jax.random.uniform(k7, (bt, 1, hwt)) > 0.3).astype(jnp.float32)
    x_t = jax.random.normal(k8, (nt, bt, tt, hwt), jnp.float32)
    g_t = 1.0 + 0.1 * jnp.arange(nt, dtype=jnp.float32)
    be_t = 0.05 * jnp.arange(nt, dtype=jnp.float32)
    x_z = x_t * nm_t[None]                                  # pre-zeroed masked positions
    small_blk = nt * 3 * tt * hwt * 4                       # forces b_tile=3 / tb=24

    y_ref_bn = _reference_masked_bn(x_z, nm_t, g_t, be_t)
    for fused in (True, False):
        y_bn = jax.block_until_ready(
            masked_batch_norm(x_z, nm_t, g_t, be_t, x_prezeroed=True,
                              use_fused=fused, num_splits=2,
                              target_block_bytes=small_blk))
        assert jnp.allclose(y_bn, y_ref_bn, rtol=1e-4, atol=1e-4), \
            f"masked_bn prezeroed fused={fused}: err={float(jnp.max(jnp.abs(y_bn - y_ref_bn)))}"

    y_ref_bn2 = _reference_masked_bn(x_t, nm_t, g_t, be_t)
    for fused in (True, False):
        y_bn2 = jax.block_until_ready(
            masked_batch_norm(x_t, nm_t, g_t, be_t, x_prezeroed=False,
                              use_fused=fused, num_splits=2,
                              target_block_bytes=small_blk))
        assert jnp.allclose(y_bn2, y_ref_bn2, rtol=1e-4, atol=1e-4), \
            f"masked_bn strict fused={fused}: err={float(jnp.max(jnp.abs(y_bn2 - y_ref_bn2)))}"

    # ---- End-to-end MAAM forward, small shapes implied by the module.
    b, nhead, t, h, w, dc = 2, 4, 8, 16, 16, 16
    l = h * w
    in_chs = 2 * nhead            # cross_coverage and self_coverage

    prev_attn = jax.nn.softmax(
        jax.random.normal(k_prev, (b * nhead, t, l), jnp.float32), axis=-1)
    curr_attn = jax.nn.softmax(
        jax.random.normal(k_curr, (b * nhead, t, l), jnp.float32), axis=-1)
    lengths = jnp.array([3 * l // 4, l])                           # per-batch valid lengths
    key_padding_mask = jnp.arange(l)[None, :] >= lengths[:, None]  # [b, l], True = padded

    params = {
        "w_conv":  0.1 * jax.random.normal(k1, (dc, in_chs, 5, 5), jnp.float32),
        "b_conv":  0.1 * jax.random.normal(k2, (dc,), jnp.float32),
        "w_conv2": 0.05 * jax.random.normal(k3, (dc, in_chs, 11, 11), jnp.float32),
        "b_conv2": 0.1 * jax.random.normal(k4, (dc,), jnp.float32),
        "w_proj":  0.2 * jax.random.normal(k5, (nhead, dc), jnp.float32),
        "w_proj2": 0.2 * jax.random.normal(k6, (nhead, dc), jnp.float32),
        "gamma":   1.0 + 0.1 * jnp.arange(nhead, dtype=jnp.float32),
        "beta":    0.05 * jnp.arange(nhead, dtype=jnp.float32),
    }

    fwd = jax.jit(functools.partial(maam_forward, nhead=nhead, h=h))
    y = jax.block_until_ready(fwd(prev_attn, curr_attn, key_padding_mask, params))

    y_ref = _reference_maam(prev_attn, curr_attn, key_padding_mask, params,
                            nhead=nhead, h=h)
    assert y.shape == (b * nhead, t, l)
    assert bool(jnp.all(jnp.isfinite(y)))
    assert jnp.allclose(y, y_ref, rtol=1e-4, atol=1e-4), \
        f"max abs err {float(jnp.max(jnp.abs(y - y_ref)))}"

    print("KERNEL_OK")
</pallas_src>

<mosaic_0001>
module attributes {stable_mosaic.version = 11 : i64} {
  func.func @_fused_bn_kernel(%arg0: i32, %arg1: memref<3x3xf32, #tpu.memory_space<smem>>, %arg2: memref<3x7x8x256xf32, #tpu.memory_space<vmem>>, %arg3: memref<7x1x256xf32, #tpu.memory_space<vmem>>, %arg4: memref<7x3x8x256xf32, #tpu.memory_space<vmem>>) attributes {dimension_semantics = [#tpu.dimension_semantics<arbitrary>], iteration_bounds = array<i64: 1>, scalar_prefetch = 0 : i64, scratch_operands = 0 : i64, tpu.core_type = #tpu.core_type<tc>, window_params = [{transform_indices = @transform_0, window_bounds = array<i64: 3, 3>}, {pipeline_mode = #tpu.pipeline_mode<synchronous>, transform_indices = @transform_1, window_bounds = array<i64: 3, 7, 8, 256>}, {pipeline_mode = #tpu.pipeline_mode<synchronous>, transform_indices = @transform_2, window_bounds = array<i64: 7, 1, 256>}, {pipeline_mode = #tpu.pipeline_mode<synchronous>, transform_indices = @transform_3, window_bounds = array<i64: 7, 3, 8, 256>}]} {
    %c0 = arith.constant 0 : index
    %c0_0 = arith.constant 0 : index
    %c0_1 = arith.constant 0 : index
    %0 = vector.load %arg3[%c0, %c0_0, %c0_1] : memref<7x1x256xf32, #tpu.memory_space<vmem>>, vector<7x1x256xf32>
    %c2 = arith.constant 2 : index
    %c0_2 = arith.constant 0 : index
    %1 = memref.load %arg1[%c2, %c0_2] : memref<3x3xf32, #tpu.memory_space<smem>>
    %c0_3 = arith.constant 0 : index
    %c0_4 = arith.constant 0 : index
    %c0_5 = arith.constant 0 : index
    %c0_6 = arith.constant 0 : index
    %2 = vector.load %arg2[%c0_3, %c0_4, %c0_5, %c0_6] : memref<3x7x8x256xf32, #tpu.memory_space<vmem>>, vector<1x7x8x256xf32>
    %3 = vector.shape_cast %2 : vector<1x7x8x256xf32> to vector<7x8x256xf32>
    %cst = arith.constant dense<0.000000e+00> : vector<7x8xf32>
    %4 = vector.multi_reduction <add>, %3, %cst [2] : vector<7x8x256xf32> to vector<7x8xf32>
    %5 = vector.shape_cast %4 : vector<7x8xf32> to vector<7x8x1xf32>
    %cst_7 = arith.constant dense<0.000000e+00> : vector<7x1xf32>
    %6 = vector.multi_reduction <add>, %5, %cst_7 [1] : vector<7x8x1xf32> to vector<7x1xf32>
    %7 = vector.shape_cast %6 : vector<7x1xf32> to vector<7x1x1xf32>
    %cst_8 = arith.constant dense<0.000000e+00> : vector<1x1xf32>
    %8 = vector.multi_reduction <add>, %7, %cst_8 [0] : vector<7x1x1xf32> to vector<1x1xf32>
    %9 = vector.shape_cast %8 : vector<1x1xf32> to vector<1x1x1xf32>
    %10 = vector.broadcast %1 : f32 to vector<1x1x1xf32>
    %11 = arith.divf %9, %10 : vector<1x1x1xf32>
    %12 = vector.broadcast %11 : vector<1x1x1xf32> to vector<7x8x256xf32>
    %13 = arith.subf %3, %12 : vector<7x8x256xf32>
    %14 = arith.mulf %13, %13 : vector<7x8x256xf32>
    %15 = vector.broadcast %0 : vector<7x1x256xf32> to vector<7x8x256xf32>
    %16 = arith.mulf %14, %15 : vector<7x8x256xf32>
    %cst_9 = arith.constant dense<0.000000e+00> : vector<7x8xf32>
    %17 = vector.multi_reduction <add>, %16, %cst_9 [2] : vector<7x8x256xf32> to vector<7x8xf32>
    %18 = vector.shape_cast %17 : vector<7x8xf32> to vector<7x8x1xf32>
    %cst_10 = arith.constant dense<0.000000e+00> : vector<7x1xf32>
    %19 = vector.multi_reduction <add>, %18, %cst_10 [1] : vector<7x8x1xf32> to vector<7x1xf32>
    %20 = vector.shape_cast %19 : vector<7x1xf32> to vector<7x1x1xf32>
    %cst_11 = arith.constant dense<0.000000e+00> : vector<1x1xf32>
    %21 = vector.multi_reduction <add>, %20, %cst_11 [0] : vector<7x1x1xf32> to vector<1x1xf32>
    %22 = vector.shape_cast %21 : vector<1x1xf32> to vector<1x1x1xf32>
    %23 = vector.broadcast %1 : f32 to vector<1x1x1xf32>
    %24 = arith.divf %22, %23 : vector<1x1x1xf32>
    %c0_12 = arith.constant 0 : index
    %c0_13 = arith.constant 0 : index
    %25 = memref.load %arg1[%c0_12, %c0_13] : memref<3x3xf32, #tpu.memory_space<smem>>
    %cst_14 = arith.constant 9.99999974E-6 : f32
    %26 = vector.broadcast %cst_14 : f32 to vector<1x1x1xf32>
    %27 = arith.addf %24, %26 : vector<1x1x1xf32>
    %28 = math.sqrt %27 : vector<1x1x1xf32>
    %29 = vector.broadcast %25 : f32 to vector<1x1x1xf32>
    %30 = arith.divf %29, %28 : vector<1x1x1xf32>
    %c1 = arith.constant 1 : index
    %c0_15 = arith.constant 0 : index
    %31 = memref.load %arg1[%c1, %c0_15] : memref<3x3xf32, #tpu.memory_space<smem>>
    %32 = arith.mulf %11, %30 : vector<1x1x1xf32>
    %33 = vector.broadcast %31 : f32 to vector<1x1x1xf32>
    %34 = arith.subf %33, %32 : vector<1x1x1xf32>
    %35 = vector.broadcast %30 : vector<1x1x1xf32> to vector<7x8x256xf32>
    %36 = arith.mulf %3, %35 : vector<7x8x256xf32>
    %37 = vector.broadcast %34 : vector<1x1x1xf32> to vector<7x8x256xf32>
    %38 = arith.addf %36, %37 : vector<7x8x256xf32>
    %39 = vector.broadcast %0 : vector<7x1x256xf32> to vector<7x8x256xf32>
    %40 = arith.mulf %38, %39 : vector<7x8x256xf32>
    %c0_16 = arith.constant 0 : index
    %c0_17 = arith.constant 0 : index
    %c0_18 = arith.constant 0 : index
    %c0_19 = arith.constant 0 : index
    %41 = vector.load %arg4[%c0_16, %c0_17, %c0_18, %c0_19] : memref<7x3x8x256xf32, #tpu.memory_space<vmem>>, vector<7x1x8x256xf32>
    %42 = vector.shape_cast %41 : vector<7x1x8x256xf32> to vector<7x8x256xf32>
    %43 = vector.shape_cast %40 : vector<7x8x256xf32> to vector<7x1x8x256xf32>
    tpu.vector_store %arg4[%c0_16, %c0_17, %c0_18, %c0_19], %43 {strides = array<i32>} : memref<7x3x8x256xf32, #tpu.memory_space<vmem>>, vector<7x1x8x256xf32>,
    %c1_20 = arith.constant 1 : index
    %c0_21 = arith.constant 0 : index
    %c0_22 = arith.constant 0 : index
    %c0_23 = arith.constant 0 : index
    %44 = vector.load %arg2[%c1_20, %c0_21, %c0_22, %c0_23] : memref<3x7x8x256xf32, #tpu.memory_space<vmem>>, vector<1x7x8x256xf32>
    %45 = vector.shape_cast %44 : vector<1x7x8x256xf32> to vector<7x8x256xf32>
    %cst_24 = arith.constant dense<0.000000e+00> : vector<7x8xf32>
    %46 = vector.multi_reduction <add>, %45, %cst_24 [2] : vector<7x8x256xf32> to vector<7x8xf32>
    %47 = vector.shape_cast %46 : vector<7x8xf32> to vector<7x8x1xf32>
    %cst_25 = arith.constant dense<0.000000e+00> : vector<7x1xf32>
    %48 = vector.multi_reduction <add>, %47, %cst_25 [1] : vector<7x8x1xf32> to vector<7x1xf32>
    %49 = vector.shape_cast %48 : vector<7x1xf32> to vector<7x1x1xf32>
    %cst_26 = arith.constant dense<0.000000e+00> : vector<1x1xf32>
    %50 = vector.multi_reduction <add>, %49, %cst_26 [0] : vector<7x1x1xf32> to vector<1x1xf32>
    %51 = vector.shape_cast %50 : vector<1x1xf32> to vector<1x1x1xf32>
    %52 = vector.broadcast %1 : f32 to vector<1x1x1xf32>
    %53 = arith.divf %51, %52 : vector<1x1x1xf32>
    %54 = vector.broadcast %53 : vector<1x1x1xf32> to vector<7x8x256xf32>
    %55 = arith.subf %45, %54 : vector<7x8x256xf32>
    %56 = arith.mulf %55, %55 : vector<7x8x256xf32>
    %57 = vector.broadcast %0 : vector<7x1x256xf32> to vector<7x8x256xf32>
    %58 = arith.mulf %56, %57 : vector<7x8x256xf32>
    %cst_27 = arith.constant dense<0.000000e+00> : vector<7x8xf32>
    %59 = vector.multi_reduction <add>, %58, %cst_27 [2] : vector<7x8x256xf32> to vector<7x8xf32>
    %60 = vector.shape_cast %59 : vector<7x8xf32> to vector<7x8x1xf32>
    %cst_28 = arith.constant dense<0.000000e+00> : vector<7x1xf32>
    %61 = vector.multi_reduction <add>, %60, %cst_28 [1] : vector<7x8x1xf32> to vector<7x1xf32>
    %62 = vector.shape_cast %61 : vector<7x1xf32> to vector<7x1x1xf32>
    %cst_29 = arith.constant dense<0.000000e+00> : vector<1x1xf32>
    %63 = vector.multi_reduction <add>, %62, %cst_29 [0] : vector<7x1x1xf32> to vector<1x1xf32>
    %64 = vector.shape_cast %63 : vector<1x1xf32> to vector<1x1x1xf32>
    %65 = vector.broadcast %1 : f32 to vector<1x1x1xf32>
    %66 = arith.divf %64, %65 : vector<1x1x1xf32>
    %c0_30 = arith.constant 0 : index
    %c1_31 = arith.constant 1 : index
    %67 = memref.load %arg1[%c0_30, %c1_31] : memref<3x3xf32, #tpu.memory_space<smem>>
    %cst_32 = arith.constant 9.99999974E-6 : f32
    %68 = vector.broadcast %cst_32 : f32 to vector<1x1x1xf32>
    %69 = arith.addf %66, %68 : vector<1x1x1xf32>
    %70 = math.sqrt %69 : vector<1x1x1xf32>
    %71 = vector.broadcast %67 : f32 to vector<1x1x1xf32>
    %72 = arith.divf %71, %70 : vector<1x1x1xf32>
    %c1_33 = arith.constant 1 : index
    %c1_34 = arith.constant 1 : index
    %73 = memref.load %arg1[%c1_33, %c1_34] : memref<3x3xf32, #tpu.memory_space<smem>>
    %74 = arith.mulf %53, %72 : vector<1x1x1xf32>
    %75 = vector.broadcast %73 : f32 to vector<1x1x1xf32>
    %76 = arith.subf %75, %74 : vector<1x1x1xf32>
    %77 = vector.broadcast %72 : vector<1x1x1xf32> to vector<7x8x256xf32>
    %78 = arith.mulf %45, %77 : vector<7x8x256xf32>
    %79 = vector.broadcast %76 : vector<1x1x1xf32> to vector<7x8x256xf32>
    %80 = arith.addf %78, %79 : vector<7x8x256xf32>
    %81 = vector.broadcast %0 : vector<7x1x256xf32> to vector<7x8x256xf32>
    %82 = arith.mulf %80, %81 : vector<7x8x256xf32>
    %c0_35 = arith.constant 0 : index
    %c1_36 = arith.constant 1 : index
    %c0_37 = arith.constant 0 : index
    %c0_38 = arith.constant 0 : index
    %83 = vector.load %arg4[%c0_35, %c1_36, %c0_37, %c0_38] : memref<7x3x8x256xf32, #tpu.memory_space<vmem>>, vector<7x1x8x256xf32>
    %84 = vector.shape_cast %83 : vector<7x1x8x256xf32> to vector<7x8x256xf32>
    %85 = vector.shape_cast %82 : vector<7x8x256xf32> to vector<7x1x8x256xf32>
    tpu.vector_store %arg4[%c0_35, %c1_36, %c0_37, %c0_38], %85 {strides = array<i32>} : memref<7x3x8x256xf32, #tpu.memory_space<vmem>>, vector<7x1x8x256xf32>,
    %c2_39 = arith.constant 2 : index
    %c0_40 = arith.constant 0 : index
    %c0_41 = arith.constant 0 : index
    %c0_42 = arith.constant 0 : index
    %86 = vector.load %arg2[%c2_39, %c0_40, %c0_41, %c0_42] : memref<3x7x8x256xf32, #tpu.memory_space<vmem>>, vector<1x7x8x256xf32>
    %87 = vector.shape_cast %86 : vector<1x7x8x256xf32> to vector<7x8x256xf32>
    %cst_43 = arith.constant dense<0.000000e+00> : vector<7x8xf32>
    %88 = vector.multi_reduction <add>, %87, %cst_43 [2] : vector<7x8x256xf32> to vector<7x8xf32>
    %89 = vector.shape_cast %88 : vector<7x8xf32> to vector<7x8x1xf32>
    %cst_44 = arith.constant dense<0.000000e+00> : vector<7x1xf32>
    %90 = vector.multi_reduction <add>, %89, %cst_44 [1] : vector<7x8x1xf32> to vector<7x1xf32>
    %91 = vector.shape_cast %90 : vector<7x1xf32> to vector<7x1x1xf32>
    %cst_45 = arith.constant dense<0.000000e+00> : vector<1x1xf32>
    %92 = vector.multi_reduction <add>, %91, %cst_45 [0] : vector<7x1x1xf32> to vector<1x1xf32>
    %93 = vector.shape_cast %92 : vector<1x1xf32> to vector<1x1x1xf32>
    %94 = vector.broadcast %1 : f32 to vector<1x1x1xf32>
    %95 = arith.divf %93, %94 : vector<1x1x1xf32>
    %96 = vector.broadcast %95 : vector<1x1x1xf32> to vector<7x8x256xf32>
    %97 = arith.subf %87, %96 : vector<7x8x256xf32>
    %98 = arith.mulf %97, %97 : vector<7x8x256xf32>
    %99 = vector.broadcast %0 : vector<7x1x256xf32> to vector<7x8x256xf32>
    %100 = arith.mulf %98, %99 : vector<7x8x256xf32>
    %cst_46 = arith.constant dense<0.000000e+00> : vector<7x8xf32>
    %101 = vector.multi_reduction <add>, %100, %cst_46 [2] : vector<7x8x256xf32> to vector<7x8xf32>
    %102 = vector.shape_cast %101 : vector<7x8xf32> to vector<7x8x1xf32>
    %cst_47 = arith.constant dense<0.000000e+00> : vector<7x1xf32>
    %103 = vector.multi_reduction <add>, %102, %cst_47 [1] : vector<7x8x1xf32> to vector<7x1xf32>
    %104 = vector.shape_cast %103 : vector<7x1xf32> to vector<7x1x1xf32>
    %cst_48 = arith.constant dense<0.000000e+00> : vector<1x1xf32>
    %105 = vector.multi_reduction <add>, %104, %cst_48 [0] : vector<7x1x1xf32> to vector<1x1xf32>
    %106 = vector.shape_cast %105 : vector<1x1xf32> to vector<1x1x1xf32>
    %107 = vector.broadcast %1 : f32 to vector<1x1x1xf32>
    %108 = arith.divf %106, %107 : vector<1x1x1xf32>
    %c0_49 = arith.constant 0 : index
    %c2_50 = arith.constant 2 : index
    %109 = memref.load %arg1[%c0_49, %c2_50] : memref<3x3xf32, #tpu.memory_space<smem>>
    %cst_51 = arith.constant 9.99999974E-6 : f32
    %110 = vector.broadcast %cst_51 : f32 to vector<1x1x1xf32>
    %111 = arith.addf %108, %110 : vector<1x1x1xf32>
    %112 = math.sqrt %111 : vector<1x1x1xf32>
    %113 = vector.broadcast %109 : f32 to vector<1x1x1xf32>
    %114 = arith.divf %113, %112 : vector<1x1x1xf32>
    %c1_52 = arith.constant 1 : index
    %c2_53 = arith.constant 2 : index
    %115 = memref.load %arg1[%c1_52, %c2_53] : memref<3x3xf32, #tpu.memory_space<smem>>
    %116 = arith.mulf %95, %114 : vector<1x1x1xf32>
    %117 = vector.broadcast %115 : f32 to vector<1x1x1xf32>
    %118 = arith.subf %117, %116 : vector<1x1x1xf32>
    %119 = vector.broadcast %114 : vector<1x1x1xf32> to vector<7x8x256xf32>
    %120 = arith.mulf %87, %119 : vector<7x8x256xf32>
    %121 = vector.broadcast %118 : vector<1x1x1xf32> to vector<7x8x256xf32>
    %122 = arith.addf %120, %121 : vector<7x8x256xf32>
    %123 = vector.broadcast %0 : vector<7x1x256xf32> to vector<7x8x256xf32>
    %124 = arith.mulf %122, %123 : vector<7x8x256xf32>
    %c0_54 = arith.constant 0 : index
    %c2_55 = arith.constant 2 : index
    %c0_56 = arith.constant 0 : index
    %c0_57 = arith.constant 0 : index
    %125 = vector.load %arg4[%c0_54, %c2_55, %c0_56, %c0_57] : memref<7x3x8x256xf32, #tpu.memory_space<vmem>>, vector<7x1x8x256xf32>
    %126 = vector.shape_cast %125 : vector<7x1x8x256xf32> to vector<7x8x256xf32>
    %127 = vector.shape_cast %124 : vector<7x8x256xf32> to vector<7x1x8x256xf32>
    tpu.vector_store %arg4[%c0_54, %c2_55, %c0_56, %c0_57], %127 {strides = array<i32>} : memref<7x3x8x256xf32, #tpu.memory_space<vmem>>, vector<7x1x8x256xf32>,
    return
  }
  func.func @transform_0(%arg0: i32) -> (i32, i32) {
    %c0_i32 = arith.constant 0 : i32
    %c0_i32_0 = arith.constant 0 : i32
    %c0_i32_1 = arith.constant 0 : i32
    return %c0_i32, %c0_i32_0 : i32, i32
  }
  func.func @transform_1(%arg0: i32) -> (i32, i32, i32, i32) {
    %c0_i32 = arith.constant 0 : i32
    %c0_i32_0 = arith.constant 0 : i32
    %c0_i32_1 = arith.constant 0 : i32
    %c0_i32_2 = arith.constant 0 : i32
    %c0_i32_3 = arith.constant 0 : i32
    return %c0_i32, %c0_i32_0, %c0_i32_1, %c0_i32_2 : i32, i32, i32, i32
  }
  func.func @transform_2(%arg0: i32) -> (i32, i32, i32) {
    %c0_i32 = arith.constant 0 : i32
    %c0_i32_0 = arith.constant 0 : i32
    %c0_i32_1 = arith.constant 0 : i32
    %c0_i32_2 = arith.constant 0 : i32
    return %c0_i32, %c0_i32_0, %c0_i32_1 : i32, i32, i32
  }
  func.func @transform_3(%arg0: i32) -> (i32, i32, i32, i32) {
    %c0_i32 = arith.constant 0 : i32
    %c0_i32_0 = arith.constant 0 : i32
    %c0_i32_1 = arith.constant 0 : i32
    %c0_i32_2 = arith.constant 0 : i32
    %c0_i32_3 = arith.constant 0 : i32
    return %c0_i32, %c0_i32_0, %c0_i32_1, %c0_i32_2 : i32, i32, i32, i32
  }
}

</mosaic_0001>

<bundles_post_ra>
// kernel: tpu_custom_call.1
= control target key start
LH: loop header
LB: loop body
LE: loop exit
PB: predicated region body
PF: predicated region fallthrough
CT: control target
= control target key end

     0   :  { %8 = vsyncpa [#allocation5], 0  ;;  %s1604_s0 = inlined_call_operand.hbm [shape: f32[3,3], index: 0, kind: input, shape index: {}]   ;;  %s1605_s1 = inlined_call_operand.hbm [shape: f32[3,7,8,256], index: 1, kind: input, shape index: {}]   ;;  %s1606_s2 = inlined_call_operand.hbm [shape: f32[7,1,256], index: 2, kind: input, shape index: {}]   ;;  %s1607_s3 = inlined_call_operand.hbm [shape: f32[7,3,8,256], index: 3, kind: output, shape index: {}]  }
   0x1   :  { %9 = vsyncpa [#allocation3], 0 }
   0x2   :  { %10 = vsyncpa [#allocation8], 0 }
   0x3   :  { %11 = vsyncpa [#allocation4], 0  ;;  %s1038_s14 = scalar_lea.hbm %s1604_s0, 64 }
   0x4   :  { %p1039_p0 = scmp.ne.s32.totalorder %s1604_s0, %s1038_s14  ;;  %p1042_p1 = scmp.lt.u32.totalorder %s1038_s14, %s1604_s0 }
   0x6   :  { %p1044_p2 = pnand %p1042_p1, %p1039_p0 }
   0x8   :  { %1047 = shalt.err (!%p1044_p2)
}
   0x9   :  { %s1122_s19 = smov [#allocation2]   ;;  %s1123_s22 = smov [#allocation6]  }
   0xa   :  { %19 = dma.hbm_to_smem %s1604_s0, 64, %s1122_s19, [#allocation5]  }
   0xb   :  { %s25_s23 = sshll.u32 %s1123_s22, 4  ;;  %s1048_s26 = scalar_lea.hbm %s1605_s1, 5376  ;;  %s26_s23 = int_to_ptr.vmem [resolvable:$true] %s25_s23 }
   0xc   :  { %p1049_p3 = scmp.ne.s32.totalorder %s1605_s1, %s1048_s26  ;;  %p1052_p4 = scmp.lt.u32.totalorder %s1048_s26, %s1605_s1 }
   0xe   :  { %p1054_p5 = pnand %p1052_p4, %p1049_p3 }
  0x10   :  { %1057 = shalt.err (!%p1054_p5)
}
  0x11   :  { %s1058_s4 = scalar_lea.vmem %s26_s23, 5376  ;;  %p1063_p7 = scmp.lt.s32.totalorder %s26_s23, %s26_s23 }
  0x12   :  { %p1059_p6 = scmp.ne.s32.totalorder %s26_s23, %s1058_s4  ;;  %p1064_p8 = scmp.lt.s32.totalorder %s1058_s4, %s1058_s4 }
  0x14   :  { %p1065_p9 = por %p1064_p8, %p1063_p7 }
  0x16   :  { %p1066_p10 = pnand %p1065_p9, %p1059_p6 }
  0x18   :  { %1069 = shalt.err (!%p1066_p10)
}
  0x19   :  { %s1124_s0 = smov 256   ;;  %s1125_s5 = smov 16  }
  0x1a   :  { %31 = dma.hbm_to_vmem [thread:$0]  %s1605_s1, 5376, %s26_s23, [#allocation3], %s1124_s0, %s1124_s0, %s1125_s5  }
  0x1b   :  { %s1126_s8 = smov [#allocation7]   ;;  %s1070_s12 = scalar_lea.hbm %s1606_s2, 224 }
  0x1c   :  { %s37_s9 = sshll.u32 %s1126_s8, 4  ;;  %p1071_p11 = scmp.ne.s32.totalorder %s1606_s2, %s1070_s12  ;;  %s38_s9 = int_to_ptr.vmem [resolvable:$true] %s37_s9 }
  0x1d   :  { %p1074_p12 = scmp.lt.u32.totalorder %s1070_s12, %s1606_s2 }
  0x1f   :  { %p1076_p13 = pnand %p1074_p12, %p1071_p11 }
  0x21   :  { %1079 = shalt.err (!%p1076_p13)
}
  0x22   :  { %s1080_s17 = scalar_lea.vmem %s38_s9, 224  ;;  %p1085_p1 = scmp.lt.s32.totalorder %s38_s9, %s38_s9 }
  0x23   :  { %p1081_p0 = scmp.ne.s32.totalorder %s38_s9, %s1080_s17  ;;  %p1086_p2 = scmp.lt.s32.totalorder %s1080_s17, %s1080_s17 }
  0x25   :  { %p1087_p3 = por %p1086_p2, %p1085_p1 }
  0x27   :  { %p1088_p4 = pnand %p1087_p3, %p1081_p0 }
  0x29   :  { %1091 = shalt.err (!%p1088_p4)
}
  0x2a   :  { %s1127_s1 = smov 32   ;;  %s1128_s18 = smov 2  }
  0x2b   :  { %43 = dma.hbm_to_vmem [thread:$0]  %s1606_s2, 224, %s38_s9, [#allocation8], %s1127_s1, %s1127_s1, %s1128_s18  }
  0x2c   :  { %1114 = dma.done.wait [#allocation5], 64  }
  0x2d   :  { %1115 = vsyncadd [#allocation5], 4294967232 }
  0x2e   :  { %1116 = dma.done.wait [#allocation3], 5376  }
  0x2f   :  { %1117 = vsyncadd [#allocation3], 4294961920 }
  0x30   :  { %1118 = dma.done.wait [#allocation8], 224  }
  0x31   :  { %1119 = vsyncadd [#allocation8], 4294967072 }
  0x32   :  { %53 = sfence }
  0x33   :  { %v1189_v0 = vld [vmem:[#allocation6 + $0x70] sm:$0xff]  ;;  %v1191_v1 = vld [vmem:[#allocation6 + $0x78] sm:$0xff]  ;;  %v1193_v2 = vld [vmem:[#allocation6] sm:$0xff]  ;;  %s1315_s2 = sld [smem:[#allocation2 + $0x100]]  ;;  %s970_s21 = sld [smem:[#allocation2 + $0x1]] }
  0x34   :  { %v424_v3 = vadd.f32 %v1191_v1, %v1189_v0  ;;  %v1197_v4 = vld [vmem:[#allocation6 + $0x8] sm:$0xff]  ;;  %v1199_v5 = vld [vmem:[#allocation6 + $0x80] sm:$0xff]  ;;  %v1205_v8 = vld [vmem:[#allocation6 + $0x10] sm:$0xff]  ;;  %s337_s22 = sld [smem:[#allocation2]]  ;;  %s1508_s23 = sld [smem:[#allocation2 + $0x81]] }
  0x35   :  { %v1201_v6 = vld [vmem:[#allocation6 + $0x88] sm:$0xff]  ;;  %v76_v7 = vadd.f32 %v1197_v4, %v1193_v2  ;;  %v1207_v9 = vld [vmem:[#allocation6 + $0x18] sm:$0xff]  ;;  %v1213_v12 = vld [vmem:[#allocation6 + $0xf0] sm:$0xff]  ;;  %s1510_s24 = sld [smem:[#allocation2 + $0x80]]  ;;  %s1512_s25 = sld [smem:[#allocation2 + $0x2]] }
  0x36   :  { %425 = vadd.xlane.f32.xlu1 %v424_v3  ;;  %v427_v10 = vadd.f32 %v1201_v6, %v1199_v5  ;;  %v79_v11 = vadd.f32 %v1207_v9, %v1205_v8  ;;  %v1215_v13 = vld [vmem:[#allocation6 + $0xf8] sm:$0xff]  ;;  %v1217_v14 = vld [vmem:[#allocation6 + $0xe0] sm:$0xff]  ;;  %v1219_v15 = vld [vmem:[#allocation6 + $0xe8] sm:$0xff]  ;;  %s1554_s26 = sld [smem:[#allocation2 + $0x82]]  ;;  %s1129_s27 = smov [#allocation9]  }
  0x37   :  { %77 = vadd.xlane.f32.xlu0 %v76_v7  ;;  %v697_v16 = vadd.f32 %v1215_v13, %v1213_v12  ;;  %v694_v17 = vadd.f32 %v1219_v15, %v1217_v14  ;;  %v1225_v18 = vld [vmem:[#allocation6 + $0x90] sm:$0xff]  ;;  %v1227_v19 = vld [vmem:[#allocation6 + $0x98] sm:$0xff]  ;;  %v1229_v20 = vld [vmem:[#allocation6 + $0x20] sm:$0xff]  ;;  %s954_s28 = sshll.u32 %s1129_s27, 4  ;;  %s955_s28 = int_to_ptr.vmem [resolvable:$true] %s954_s28 }
  0x38   :  { %v1231_v21 = vld [vmem:[#allocation6 + $0x28] sm:$0xff]  ;;  %v430_v22 = vadd.f32 %v1227_v19, %v1225_v18  ;;  %v1237_v24 = vld [vmem:[#allocation6 + $0x30] sm:$0xff]  ;;  %v1239_v25 = vld [vmem:[#allocation6 + $0x38] sm:$0xff]  ;;  %s1092_s29 = scalar_lea.vmem %s955_s28, 5376  ;;  %p1097_p6 = scmp.lt.s32.totalorder %s955_s28, %s955_s28 }
  0x39   :  { %v82_v23 = vadd.f32 %v1231_v21, %v1229_v20  ;;  %1633 = vst [vmem:[#allocation14_spill] sm:$0xff] %v1239_v25  ;;  %v1241_v26 = vld [vmem:[#allocation6 + $0x100] sm:$0xff]  ;;  %v1243_v27 = vld [vmem:[#allocation6 + $0x108] sm:$0xff]  ;;  %v85_v28 = vadd.f32 %v1239_v25, %v1237_v24  ;;  %v1249_v30 = vld [vmem:[#allocation6 + $0x110] sm:$0xff]  ;;  %p1093_p5 = scmp.ne.s32.totalorder %s955_s28, %s1092_s29  ;;  %p1098_p7 = scmp.lt.s32.totalorder %s1092_s29, %s1092_s29 }
  0x3a   :  { %428 = vadd.xlane.f32.xlu1 %v427_v10  ;;  %1634 = vst [vmem:[#allocation15_spill] sm:$0xff] %v1241_v26  ;;  %1635 = vst [vmem:[#allocation16_spill] sm:$0xff] %v1243_v27  ;;  %v700_v29 = vadd.f32 %v1243_v27, %v1241_v26  ;;  %v1251_v31 = vld [vmem:[#allocation6 + $0x118] sm:$0xff]  ;;  %v1253_v32 = vld [vmem:[#allocation6 + $0xa0] sm:$0xff] }
  0x3b   :  { %80 = vadd.xlane.f32.xlu0 %v79_v11  ;;  %1636 = vst [vmem:[#allocation17_spill] sm:$0xff] %v1249_v30  ;;  %1637 = vst [vmem:[#allocation18_spill] sm:$0xff] %v1251_v31  ;;  %v1255_v33 = vld [vmem:[#allocation6 + $0xa8] sm:$0xff]  ;;  %v703_v34 = vadd.f32 %v1251_v31, %v1249_v30  ;;  %v1261_v36 = vld [vmem:[#allocation6 + $0xb0] sm:$0xff]  ;;  %p1099_p8 = por %p1098_p7, %p1097_p6 }
  0x3c   :  { %1638 = vst [vmem:[#allocation19_spill] sm:$0xff] %v1253_v32  ;;  %1639 = vst [vmem:[#allocation20_spill] sm:$0xff] %v1255_v33  ;;  %v433_v35 = vadd.f32 %v1255_v33, %v1253_v32  ;;  %v1263_v37 = vld [vmem:[#allocation6 + $0xb8] sm:$0xff]  ;;  %v1265_v38 = vld [vmem:[#allocation6 + $0x40] sm:$0xff] }
  0x3d   :  { %1640 = vst [vmem:[#allocation21_spill] sm:$0xff] %v1261_v36  ;;  %1641 = vst [vmem:[#allocation22_spill] sm:$0xff] %v1263_v37  ;;  %v1267_v39 = vld [vmem:[#allocation6 + $0x48] sm:$0xff]  ;;  %v436_v40 = vadd.f32 %v1263_v37, %v1261_v36  ;;  %v1273_v42 = vld [vmem:[#allocation6 + $0x50] sm:$0xff]  ;;  %p1100_p9 = pnand %p1099_p8, %p1093_p5 }
  0x3e   :  { %698 = vadd.xlane.f32.xlu1 %v697_v16  ;;  %1642 = vst [vmem:[#allocation23_spill] sm:$0xff] %v1265_v38  ;;  %1643 = vst [vmem:[#allocation24_spill] sm:$0xff] %v1267_v39  ;;  %v88_v41 = vadd.f32 %v1267_v39, %v1265_v38  ;;  %v1275_v43 = vld [vmem:[#allocation6 + $0x58] sm:$0xff]  ;;  %v1277_v44 = vld [vmem:[#allocation6 + $0x120] sm:$0xff] }
  0x3f   :  { %695 = vadd.xlane.f32.xlu0 %v694_v17  ;;  %1644 = vst [vmem:[#allocation25_spill] sm:$0xff] %v1273_v42  ;;  %1645 = vst [vmem:[#allocation26_spill] sm:$0xff] %v1275_v43  ;;  %v1279_v45 = vld [vmem:[#allocation6 + $0x128] sm:$0xff]  ;;  %v91_v46 = vadd.f32 %v1275_v43, %v1273_v42  ;;  %v1285_v48 = vld [vmem:[#allocation6 + $0x130] sm:$0xff] }
  0x40   :  { %1646 = vst [vmem:[#allocation27_spill] sm:$0xff] %v1277_v44  ;;  %1647 = vst [vmem:[#allocation28_spill] sm:$0xff] %v1279_v45  ;;  %v706_v47 = vadd.f32 %v1279_v45, %v1277_v44  ;;  %v1287_v49 = vld [vmem:[#allocation6 + $0x138] sm:$0xff]  ;;  %v1289_v50 = vld [vmem:[#allocation6 + $0xc0] sm:$0xff] }
  0x41   :  { %1648 = vst [vmem:[#allocation29_spill] sm:$0xff] %v1285_v48  ;;  %1649 = vst [vmem:[#allocation30_spill] sm:$0xff] %v1287_v49  ;;  %v1291_v51 = vld [vmem:[#allocation6 + $0xc8] sm:$0xff]  ;;  %v709_v52 = vadd.f32 %v1287_v49, %v1285_v48  ;;  %v1297_v54 = vld [vmem:[#allocation6 + $0xd0] sm:$0xff]  ;;  %v145_v48 = vstv %s1315_s2 }
  0x42   :  { %431 = vadd.xlane.f32.xlu1 %v430_v22  ;;  %1650 = vst [vmem:[#allocation31_spill] sm:$0xff] %v1289_v50  ;;  %1651 = vst [vmem:[#allocation32_spill] sm:$0xff] %v1291_v51  ;;  %v439_v53 = vadd.f32 %v1291_v51, %v1289_v50  ;;  %v1299_v55 = vld [vmem:[#allocation6 + $0xd8] sm:$0xff]  ;;  %v1301_v56 = vld [vmem:[#allocation6 + $0x60] sm:$0xff]  ;;  %982 = vrcp.f32 %v145_v48 }
  0x43   :  { %83 = vadd.xlane.f32.xlu0 %v82_v23  ;;  %1652 = vst [vmem:[#allocation33_spill] sm:$0xff] %v1297_v54  ;;  %1653 = vst [vmem:[#allocation34_spill] sm:$0xff] %v1299_v55  ;;  %v1303_v57 = vld [vmem:[#allocation6 + $0x68] sm:$0xff]  ;;  %v442_v58 = vadd.f32 %v1299_v55, %v1297_v54  ;;  %v1309_v60 = vld [vmem:[#allocation6 + $0x140] sm:$0xff]  ;;  %v183_v55 = vlaneseq }
  0x44   :  { %1654 = vst [vmem:[#allocation35_spill] sm:$0xff] %v1301_v56  ;;  %1655 = vst [vmem:[#allocation36_spill] sm:$0xff] %v1303_v57  ;;  %v94_v59 = vadd.f32 %v1303_v57, %v1301_v56  ;;  %v1311_v61 = vld [vmem:[#allocation6 + $0x148] sm:$0xff] }
  0x45   :  { %1656 = vst [vmem:[#allocation37_spill] sm:$0xff] %v1309_v60  ;;  %1657 = vst [vmem:[#allocation38_spill] sm:$0xff] %v1311_v61  ;;  %v712_v62 = vadd.f32 %v1311_v61, %v1309_v60 }
  0x46   :  { %86 = vadd.xlane.f32.xlu1 %v85_v28 }
  0x47   :  { %701 = vadd.xlane.f32.xlu0 %v700_v29 }
  0x4a   :  { %704 = vadd.xlane.f32.xlu1 %v703_v34 }
  0x4b   :  { %434 = vadd.xlane.f32.xlu0 %v433_v35 }
  0x4e   :  { %437 = vadd.xlane.f32.xlu1 %v436_v40 }
  0x4f   :  { %89 = vadd.xlane.f32.xlu0 %v88_v41 }
  0x52   :  { %92 = vadd.xlane.f32.xlu1 %v91_v46 }
  0x53   :  { %707 = vadd.xlane.f32.xlu0 %v706_v47 }
  0x56   :  { %710 = vadd.xlane.f32.xlu1 %v709_v52 }
  0x57   :  { %440 = vadd.xlane.f32.xlu0 %v439_v53 }
  0x5a   :  { %443 = vadd.xlane.f32.xlu1 %v442_v58 }
  0x5b   :  { %95 = vadd.xlane.f32.xlu0 %v94_v59 }
  0x5f   :  { %713 = vadd.xlane.f32.xlu0 %v712_v62 }
  0xc3   :  { %v426_v63 = vpop.xlane.xlu1 %425 }
  0xc4   :  { %v78_v3 = vpop.xlane.xlu0 %77  ;;  %v445_v10 = vrot.slane %v426_v63, 4 }
  0xc5   :  { %v97_v17 = vrot.slane %v78_v3, 4 }
  0xc6   :  { %v446_v28 = vadd.f32 %v445_v10, %v426_v63 }
  0xc7   :  { %v429_v7 = vpop.xlane.xlu1 %428  ;;  %v98_v40 = vadd.f32 %v97_v17, %v78_v3 }
  0xc8   :  { %v451_v11 = vrot.slane %v429_v7, 4  ;;  %v81_v16 = vpop.xlane.xlu0 %80  ;;  %v447_v52 = vrot.slane %v446_v28, 2 }
  0xc9   :  { %v103_v22 = vrot.slane %v81_v16, 4  ;;  %v99_v61 = vrot.slane %v98_v40, 2 }
  0xca   :  { %v452_v29 = vadd.f32 %v451_v11, %v429_v7  ;;  %v448_v10 = vadd.f32 %v447_v52, %v446_v28 }
  0xcb   :  { %v699_v23 = vpop.xlane.xlu1 %698  ;;  %v104_v46 = vadd.f32 %v103_v22, %v81_v16  ;;  %v100_v22 = vadd.f32 %v99_v61, %v98_v40 }
  0xcc   :  { %v721_v34 = vrot.slane %v699_v23, 4  ;;  %v696_v35 = vpop.xlane.xlu0 %695  ;;  %v453_v53 = vrot.slane %v452_v29, 2  ;;  %v449_v45 = vrot.slane %v448_v10, 1 }
  0xcd   :  { %v715_v41 = vrot.slane %v696_v35, 4  ;;  %v105_v56 = vrot.slane %v104_v46, 2  ;;  %v101_v28 = vrot.slane %v100_v22, 1 }
  0xce   :  { %v722_v58 = vadd.f32 %v721_v34, %v699_v23  ;;  %v454_v3 = vadd.f32 %v453_v53, %v452_v29  ;;  %v1317_v23 = vshrl.u32 %v183_v55, 7 }
  0xcf   :  { %v432_v47 = vpop.xlane.xlu1 %431  ;;  %v716_v60 = vadd.f32 %v715_v41, %v696_v35  ;;  %v106_v50 = vadd.f32 %v105_v56, %v104_v46  ;;  %v102_v39 = vadd.f32 %v101_v28, %v100_v22 }
  0xd0   :  { %v457_v59 = vrot.slane %v432_v47, 4  ;;  %v84_v62 = vpop.xlane.xlu0 %83  ;;  %v723_v11 = vrot.slane %v722_v58, 2  ;;  %v1321_v56 = vsub.s32 0, %v1317_v23 }
  0xd1   :  { %v109_v57 = vrot.slane %v84_v62, 4  ;;  %v717_v54 = vrot.slane %v716_v60, 2  ;;  %v107_v43 = vrot.slane %v106_v50, 1 }
  0xd2   :  { %v458_v63 = vadd.f32 %v457_v59, %v432_v47  ;;  %v455_v47 = vrot.slane %v454_v3, 1  ;;  %v724_v59 = vadd.f32 %v723_v11, %v722_v58 }
  0xd3   :  { %v87_v7 = vpop.xlane.xlu1 %86  ;;  %v110_v51 = vadd.f32 %v109_v57, %v84_v62  ;;  %v718_v29 = vadd.f32 %v717_v54, %v716_v60  ;;  %v108_v37 = vadd.f32 %v107_v43, %v106_v50 }
  0xd4   :  { %v115_v16 = vrot.slane %v87_v7, 4  ;;  %v702_v17 = vpop.xlane.xlu0 %701  ;;  %v459_v34 = vrot.slane %v458_v63, 2  ;;  %v725_v42 = vrot.slane %v724_v59, 1 }
  0xd5   :  { %v727_v35 = vrot.slane %v702_v17, 4  ;;  %v111_v52 = vrot.slane %v110_v51, 2  ;;  %v719_v54 = vrot.slane %v718_v29, 1 }
  0xd6   :  { %v116_v49 = vadd.f32 %v115_v16, %v87_v7  ;;  %v460_v55 = vadd.f32 %v459_v34, %v458_v63  ;;  %v450_v7 = vadd.f32 %v449_v45, %v448_v10  ;;  %v456_v16 = vadd.f32 %v455_v47, %v454_v3 }
  0xd7   :  { %v705_v41 = vpop.xlane.xlu1 %704  ;;  %v728_v40 = vadd.f32 %v727_v35, %v702_v17  ;;  %v112_v60 = vadd.f32 %v111_v52, %v110_v51  ;;  %v726_v35 = vadd.f32 %v725_v42, %v724_v59  ;;  %v720_v47 = vadd.f32 %v719_v54, %v718_v29 }
  0xd8   :  { %v435_v44 = vpop.xlane.xlu0 %434  ;;  %v733_v61 = vrot.slane %v705_v41, 4  ;;  %v117_v57 = vrot.slane %v116_v49, 2  ;;  %v461_v32 = vrot.slane %v460_v55, 1  ;;  %v139_v51 = vadd.f32 %v108_v37, %v102_v39 }
  0xd9   :  { %v463_v53 = vrot.slane %v435_v44, 4  ;;  %v729_v63 = vrot.slane %v728_v40, 2  ;;  %v757_v29 = vadd.f32 %v726_v35, %v720_v47 }
  0xda   :  { %v734_v36 = vadd.f32 %v733_v61, %v705_v41  ;;  %v118_v31 = vadd.f32 %v117_v57, %v116_v49  ;;  %v462_v41 = vadd.f32 %v461_v32, %v460_v55 }
  0xdb   :  { %v464_v46 = vadd.f32 %v463_v53, %v435_v44  ;;  %v438_v62 = vpop.xlane.xlu1 %437  ;;  %v487_v44 = vadd.f32 %v456_v16, %v450_v7  ;;  %v113_v53 = vrot.slane %v112_v60, 1 }
  0xdc   :  { %v469_v58 = vrot.slane %v438_v62, 4  ;;  %v90_v11 = vpop.xlane.xlu0 %89  ;;  %v735_v52 = vrot.slane %v734_v36, 2  ;;  %v119_v61 = vrot.slane %v118_v31, 1 }
  0xdd   :  { %v121_v38 = vrot.slane %v90_v11, 4  ;;  %v465_v48 = vrot.slane %v464_v46, 2  ;;  %v488_v32 = vadd.f32 %v487_v44, %v462_v41 }
  0xde   :  { %v470_v33 = vadd.f32 %v469_v58, %v438_v62  ;;  %v730_v62 = vadd.f32 %v729_v63, %v728_v40  ;;  %v736_v37 = vadd.f32 %v735_v52, %v734_v36  ;;  %v120_v55 = vadd.f32 %v119_v61, %v118_v31 }
  0xdf   :  { %v122_v34 = vadd.f32 %v121_v38, %v90_v11  ;;  %v93_v17 = vpop.xlane.xlu1 %92  ;;  %v466_v43 = vadd.f32 %v465_v48, %v464_v46  ;;  %v1323_v38 = vpop.eup %982  ;;  %v114_v11 = vadd.f32 %v113_v53, %v112_v60 }
  0xe0   :  { %v471_v45 = vrot.slane %v470_v33, 2  ;;  %v127_v10 = vrot.slane %v93_v17, 4  ;;  %v708_v3 = vpop.xlane.xlu0 %707  ;;  %v731_v40 = vrot.slane %v730_v62, 1  ;;  %v737_v47 = vrot.slane %v736_v37, 1 }
  0xe1   :  { %v123_v22 = vrot.slane %v122_v34, 2  ;;  %v739_v28 = vrot.slane %v708_v3, 4  ;;  %v467_v39 = vrot.slane %v466_v43, 1 }
  0xe2   :  { %v128_v50 = vadd.f32 %v127_v10, %v93_v17  ;;  %v472_v7 = vadd.f32 %v471_v45, %v470_v33 }
  0xe3   :  { %v740_v49 = vadd.f32 %v739_v28, %v708_v3  ;;  %v711_v57 = vpop.xlane.xlu1 %710  ;;  %v124_v42 = vadd.f32 %v123_v22, %v122_v34  ;;  %v140_v22 = vadd.f32 %v139_v51, %v114_v11  ;;  %v468_v53 = vadd.f32 %v467_v39, %v466_v43 }
  0xe4   :  { %v129_v59 = vrot.slane %v128_v50, 2  ;;  %v745_v16 = vrot.slane %v711_v57, 4  ;;  %v441_v58 = vpop.xlane.xlu0 %440  ;;  %v473_v10 = vrot.slane %v472_v7, 1 }
  0xe5   :  { %v741_v54 = vrot.slane %v740_v49, 2  ;;  %v475_v30 = vrot.slane %v441_v58, 4  ;;  %v125_v3 = vrot.slane %v124_v42, 1  ;;  %v141_v41 = vadd.f32 %v140_v22, %v120_v55 }
  0xe6   :  { %v130_v46 = vadd.f32 %v129_v59, %v128_v50  ;;  %v746_v48 = vadd.f32 %v745_v16, %v711_v57  ;;  %v732_v50 = vadd.f32 %v731_v40, %v730_v62  ;;  %v489_v11 = vadd.f32 %v488_v32, %v468_v53 }
  0xe7   :  { %v476_v63 = vadd.f32 %v475_v30, %v441_v58  ;;  %v444_v17 = vpop.xlane.xlu1 %443  ;;  %v742_v28 = vadd.f32 %v741_v54, %v740_v49  ;;  %v474_v30 = vadd.f32 %v473_v10, %v472_v7  ;;  %v126_v61 = vadd.f32 %v125_v3, %v124_v42 }
  0xe8   :  { %v747_v33 = vrot.slane %v746_v48, 2  ;;  %v481_v34 = vrot.slane %v444_v17, 4  ;;  %v96_v45 = vpop.xlane.xlu0 %95  ;;  %v131_v36 = vrot.slane %v130_v46, 1  ;;  %v738_v49 = vadd.f32 %v737_v47, %v736_v37 }
  0xe9   :  { %v477_v35 = vrot.slane %v476_v63, 2  ;;  %v133_v60 = vrot.slane %v96_v45, 4  ;;  %v743_v58 = vrot.slane %v742_v28, 1  ;;  %v490_v40 = vadd.f32 %v489_v11, %v474_v30 }
  0xea   :  { %v482_v52 = vadd.f32 %v481_v34, %v444_v17  ;;  %v748_v57 = vadd.f32 %v747_v33, %v746_v48  ;;  %v132_v54 = vadd.f32 %v131_v36, %v130_v46  ;;  %v758_v48 = vadd.f32 %v757_v29, %v732_v50  ;;  %v55_v33 = vld [vmem:[#allocation7 + $0x2] sm:$0x3] }
  0xeb   :  { %v478_v44 = vadd.f32 %v477_v35, %v476_v63  ;;  %v134_v31 = vadd.f32 %v133_v60, %v96_v45  ;;  %v1326_v7 = vsub.s32 1, %v1317_v23  ;;  %v142_v42 = vadd.f32 %v141_v41, %v126_v61  ;;  %v56_v35 = vld [vmem:[#allocation7 + $0x4] sm:$0x3] }
  0xec   :  { %v483_v59 = vrot.slane %v482_v52, 2  ;;  %v714_v16 = vpop.xlane.xlu0 %713  ;;  %v749_v43 = vrot.slane %v748_v57, 1  ;;  %v744_v55 = vadd.f32 %v743_v58, %v742_v28  ;;  %v759_v34 = vadd.f32 %v758_v48, %v738_v49 }
  0xed   :  { %v479_v27 = vrot.slane %v478_v44, 1  ;;  %v135_v26 = vrot.slane %v134_v31, 2  ;;  %v751_v51 = vrot.slane %v714_v16, 4  ;;  %v143_v46 = vadd.f32 %v142_v42, %v132_v54 }
  0xee   :  { %v484_v25 = vadd.f32 %v483_v59, %v482_v52  ;;  %v750_v45 = vadd.f32 %v749_v43, %v748_v57  ;;  %v1329_v60 = vrot.slane %v55_v33, %v1321_v56  ;;  %v760_v23 = vadd.f32 %v759_v34, %v744_v55 }
  0xef   :  { %v480_v39 = vadd.f32 %v479_v27, %v478_v44  ;;  %v136_v17 = vadd.f32 %v135_v26, %v134_v31  ;;  %v752_v62 = vadd.f32 %v751_v51, %v714_v16  ;;  %v54_v26 = vld [vmem:[#allocation7] sm:$0x3]  ;;  %v1332_v28 = vrot.slane %v55_v33, %v1326_v7 }
  0xf0   :  { %v485_v63 = vrot.slane %v484_v25, 1  ;;  %v1341_v52 = vrot.slane %v54_v26, %v1326_v7  ;;  %v1344_v50 = vrot.slane %v56_v35, %v1321_v56  ;;  %v761_v57 = vadd.f32 %v760_v23, %v750_v45 }
  0xf1   :  { %v137_v10 = vrot.slane %v136_v17, 1  ;;  %v753_v3 = vrot.slane %v752_v62, 2  ;;  %v491_v37 = vadd.f32 %v490_v40, %v480_v39  ;;  %v1350_v41 = vrot.slane %v56_v35, %v1326_v7 }
  0xf2   :  { %v486_v32 = vadd.f32 %v485_v63, %v484_v25  ;;  %v1338_v25 = vrot.slane %v54_v26, %v1321_v56 }
  0xf3   :  { %v138_v22 = vadd.f32 %v137_v10, %v136_v17  ;;  %v754_v27 = vadd.f32 %v753_v3, %v752_v62 }
  0xf4   :  { %v492_v29 = vadd.f32 %v491_v37, %v486_v32 }
  0xf5   :  { %v144_v47 = vadd.f32 %v143_v46, %v138_v22  ;;  %v755_v53 = vrot.slane %v754_v27, 1 }
  0xf6   :  { %v1335_v36 = vmul.f32 %v1323_v38, %v492_v29 }
  0xf7   :  { %v1347_v44 = vmul.f32 %v1323_v38, %v144_v47  ;;  %v756_v31 = vadd.f32 %v755_v53, %v754_v27 }
  0xf8   :  { %v496_v30 = vsub.f32 %v1199_v5, %v1335_v36  ;;  %v497_v61 = vsub.f32 %v1201_v6, %v1335_v36  ;;  %v494_v59 = vsub.f32 %v1189_v0, %v1335_v36  ;;  %v495_v16 = vsub.f32 %v1191_v1, %v1335_v36  ;;  %v57_v0 = vld [vmem:[#allocation7 + $0x6] sm:$0x3] }
  0xf9   :  { %v762_v58 = vadd.f32 %v761_v57, %v756_v31  ;;  %v150_v51 = vsub.f32 %v1205_v8, %v1347_v44  ;;  %v151_v49 = vsub.f32 %v1207_v9, %v1347_v44  ;;  %v148_v11 = vsub.f32 %v1193_v2, %v1347_v44 }
  0xfa   :  { %v149_v5 = vsub.f32 %v1197_v4, %v1347_v44  ;;  %v510_v6 = vmul.f32 %v496_v30, %v496_v30  ;;  %v511_v54 = vmul.f32 %v497_v61, %v497_v61  ;;  %v508_v43 = vmul.f32 %v494_v59, %v494_v59 }
  0xfb   :  { %v1369_v39 = vmul.f32 %v1323_v38, %v762_v58  ;;  %v164_v1 = vmul.f32 %v150_v51, %v150_v51  ;;  %v165_v17 = vmul.f32 %v151_v49, %v151_v49  ;;  %v162_v62 = vmul.f32 %v148_v11, %v148_v11  ;;  %v1658_v58 = vld [vmem:[#allocation14_spill] sm:$0xff] }
  0xfc   :  { %v163_v8 = vmul.f32 %v149_v5, %v149_v5  ;;  %v524_v48 = vmul.f32 %v510_v6, %v1329_v60  ;;  %v525_v9 = vmul.f32 %v511_v54, %v1332_v28  ;;  %v509_v40 = vmul.f32 %v495_v16, %v495_v16  ;;  %v1659_v6 = vld [vmem:[#allocation15_spill] sm:$0xff] }
  0xfd   :  { %v255_v2 = vmul.f32 %v1329_v60, %v164_v1  ;;  %v256_v4 = vmul.f32 %v1332_v28, %v165_v17  ;;  %v253_v63 = vmul.f32 %v1338_v25, %v162_v62  ;;  %v1377_v42 = vrot.slane %v57_v0, %v1321_v56  ;;  %v1660_v1 = vld [vmem:[#allocation16_spill] sm:$0xff]  ;;  %v1661_v62 = vld [vmem:[#allocation17_spill] sm:$0xff] }
  0xfe   :  { %v254_v55 = vmul.f32 %v1341_v52, %v163_v8  ;;  %v539_v10 = vadd.f32 %v525_v9, %v524_v48  ;;  %v522_v3 = vmul.f32 %v508_v43, %v1338_v25  ;;  %v766_v33 = vsub.f32 %v1213_v12, %v1369_v39 }
  0xff   :  { %v270_v34 = vadd.f32 %v256_v4, %v255_v2  ;;  %v767_v37 = vsub.f32 %v1215_v13, %v1369_v39  ;;  %v764_v32 = vsub.f32 %v1217_v14, %v1369_v39  ;;  %v765_v46 = vsub.f32 %v1219_v15, %v1369_v39  ;;  %v58_v4 = vld [vmem:[#allocation7 + $0x8] sm:$0x3] }
 0x100   :  { %v267_v45 = vadd.f32 %v254_v55, %v253_v63  ;;  %v523_v22 = vmul.f32 %v509_v40, %v1341_v52  ;;  %v780_v27 = vmul.f32 %v766_v33, %v766_v33  ;;  %v498_v26 = vsub.f32 %v1225_v18, %v1335_v36  ;;  %v1662_v40 = vld [vmem:[#allocation18_spill] sm:$0xff] }
 0x101   :  { %271 = vadd.xlane.f32.xlu0 %v270_v34  ;;  %v781_v35 = vmul.f32 %v767_v37, %v767_v37  ;;  %v778_v12 = vmul.f32 %v764_v32, %v764_v32  ;;  %v779_v29 = vmul.f32 %v765_v46, %v765_v46  ;;  %v499_v13 = vsub.f32 %v1227_v19, %v1335_v36  ;;  %v1664_v32 = vld [vmem:[#allocation20_spill] sm:$0xff] }
 0x102   :  { %268 = vadd.xlane.f32.xlu1 %v267_v45  ;;  %v794_v14 = vmul.f32 %v780_v27, %v1329_v60  ;;  %v512_v23 = vmul.f32 %v498_v26, %v498_v26  ;;  %v152_v15 = vsub.f32 %v1229_v20, %v1347_v44  ;;  %v153_v47 = vsub.f32 %v1231_v21, %v1347_v44  ;;  %v1665_v45 = vld [vmem:[#allocation21_spill] sm:$0xff] }
 0x103   :  { %v795_v53 = vmul.f32 %v781_v35, %v1332_v28  ;;  %v792_v18 = vmul.f32 %v778_v12, %v1338_v25  ;;  %v793_v57 = vmul.f32 %v779_v29, %v1341_v52  ;;  %v513_v31 = vmul.f32 %v499_v13, %v499_v13 }
 0x104   :  { %v536_v30 = vadd.f32 %v523_v22, %v522_v3  ;;  %v166_v61 = vmul.f32 %v152_v15, %v152_v15  ;;  %v167_v19 = vmul.f32 %v153_v47, %v153_v47  ;;  %v154_v59 = vsub.f32 %v1237_v24, %v1347_v44  ;;  %v1663_v3 = vld [vmem:[#allocation19_spill] sm:$0xff] }
 0x105   :  { %540 = vadd.xlane.f32.xlu0 %v539_v10  ;;  %v809_v16 = vadd.f32 %v795_v53, %v794_v14  ;;  %v526_v20 = vmul.f32 %v512_v23, %v1344_v50  ;;  %v155_v21 = vsub.f32 %v1658_v58, %v1347_v44  ;;  %v1408_v51 = vrot.slane %v57_v0, %v1326_v7  ;;  %v1666_v23 = vld [vmem:[#allocation22_spill] sm:$0xff] }
 0x106   :  { %537 = vadd.xlane.f32.xlu1 %v536_v30  ;;  %v806_v49 = vadd.f32 %v793_v57, %v792_v18  ;;  %v527_v11 = vmul.f32 %v513_v31, %v1350_v41  ;;  %v168_v5 = vmul.f32 %v154_v59, %v154_v59  ;;  %v768_v54 = vsub.f32 %v1659_v6, %v1369_v39  ;;  %v1667_v18 = vld [vmem:[#allocation23_spill] sm:$0xff]  ;;  %v1668_v31 = vld [vmem:[#allocation24_spill] sm:$0xff] }
 0x107   :  { %v257_v24 = vmul.f32 %v1344_v50, %v166_v61  ;;  %v169_v43 = vmul.f32 %v155_v21, %v155_v21  ;;  %v769_v17 = vsub.f32 %v1660_v1, %v1369_v39  ;;  %v770_v8 = vsub.f32 %v1661_v62, %v1369_v39 }
 0x108   :  { %v258_v0 = vmul.f32 %v1350_v41, %v167_v19  ;;  %v259_v48 = vmul.f32 %v1377_v42, %v168_v5  ;;  %v782_v9 = vmul.f32 %v768_v54, %v768_v54  ;;  %v771_v2 = vsub.f32 %v1662_v40, %v1369_v39  ;;  %v1670_v5 = vld [vmem:[#allocation26_spill] sm:$0xff] }
 0x109   :  { %810 = vadd.xlane.f32.xlu0 %v809_v16  ;;  %v260_v63 = vmul.f32 %v1408_v51, %v169_v43  ;;  %v783_v55 = vmul.f32 %v769_v17, %v769_v17  ;;  %v784_v10 = vmul.f32 %v770_v8, %v770_v8  ;;  %v500_v33 = vsub.f32 %v1663_v3, %v1335_v36  ;;  %v1671_v43 = vld [vmem:[#allocation27_spill] sm:$0xff]  ;;  %v1672_v17 = vld [vmem:[#allocation28_spill] sm:$0xff] }
 0x10a   :  { %807 = vadd.xlane.f32.xlu1 %v806_v49  ;;  %v796_v34 = vmul.f32 %v782_v9, %v1344_v50  ;;  %v785_v37 = vmul.f32 %v771_v2, %v771_v2  ;;  %v501_v46 = vsub.f32 %v1664_v32, %v1335_v36  ;;  %v502_v22 = vsub.f32 %v1665_v45, %v1335_v36  ;;  %v1669_v49 = vld [vmem:[#allocation25_spill] sm:$0xff]  ;;  %v1675_v45 = vld [vmem:[#allocation31_spill] sm:$0xff] }
 0x10b   :  { %v542_v27 = vadd.f32 %v527_v11, %v526_v20  ;;  %v797_v26 = vmul.f32 %v783_v55, %v1350_v41  ;;  %v514_v35 = vmul.f32 %v500_v33, %v500_v33  ;;  %v1432_v12 = vrot.slane %v58_v4, %v1321_v56  ;;  %v59_v20 = vld [vmem:[#allocation7 + $0xa] sm:$0x3]  ;;  %v1674_v33 = vld [vmem:[#allocation30_spill] sm:$0xff] }
 0x10c   :  { %v273_v29 = vadd.f32 %v258_v0, %v257_v24  ;;  %v515_v13 = vmul.f32 %v501_v46, %v501_v46  ;;  %v1435_v14 = vrot.slane %v58_v4, %v1326_v7  ;;  %v503_v15 = vsub.f32 %v1666_v23, %v1335_v36  ;;  %v1673_v4 = vld [vmem:[#allocation29_spill] sm:$0xff] }
 0x10d   :  { %543 = vadd.xlane.f32.xlu0 %v542_v27  ;;  %v276_v47 = vadd.f32 %v260_v63, %v259_v48  ;;  %v798_v53 = vmul.f32 %v784_v10, %v1377_v42  ;;  %v156_v57 = vsub.f32 %v1667_v18, %v1347_v44  ;;  %v157_v30 = vsub.f32 %v1668_v31, %v1347_v44  ;;  %v1677_v31 = vld [vmem:[#allocation33_spill] sm:$0xff] }
 0x10e   :  { %274 = vadd.xlane.f32.xlu1 %v273_v29  ;;  %v812_v61 = vadd.f32 %v797_v26, %v796_v34  ;;  %v799_v19 = vmul.f32 %v785_v37, %v1408_v51  ;;  %v528_v59 = vmul.f32 %v514_v35, %v1377_v42  ;;  %v516_v16 = vmul.f32 %v502_v22, %v502_v22  ;;  %v1676_v35 = vld [vmem:[#allocation32_spill] sm:$0xff] }
 0x10f   :  { %v529_v58 = vmul.f32 %v515_v13, %v1408_v51  ;;  %v517_v21 = vmul.f32 %v503_v15, %v503_v15  ;;  %v158_v11 = vsub.f32 %v1669_v49, %v1347_v44  ;;  %v159_v6 = vsub.f32 %v1670_v5, %v1347_v44 }
 0x110   :  { %v170_v54 = vmul.f32 %v156_v57, %v156_v57  ;;  %v171_v24 = vmul.f32 %v157_v30, %v157_v30  ;;  %v772_v1 = vsub.f32 %v1671_v43, %v1369_v39  ;;  %v773_v62 = vsub.f32 %v1672_v17, %v1369_v39 }
 0x111   :  { %277 = vadd.xlane.f32.xlu0 %v276_v47  ;;  %v172_v8 = vmul.f32 %v158_v11, %v158_v11  ;;  %v173_v0 = vmul.f32 %v159_v6, %v159_v6  ;;  %v1456_v48 = vrot.slane %v59_v20, %v1321_v56  ;;  %v1459_v9 = vrot.slane %v59_v20, %v1326_v7  ;;  %v1679_v20 = vld [vmem:[#allocation35_spill] sm:$0xff] }
 0x112   :  { %813 = vadd.xlane.f32.xlu1 %v812_v61  ;;  %v786_v40 = vmul.f32 %v772_v1, %v772_v1  ;;  %v787_v2 = vmul.f32 %v773_v62, %v773_v62  ;;  %v774_v63 = vsub.f32 %v1673_v4, %v1369_v39  ;;  %v815_v55 = vadd.f32 %v799_v19, %v798_v53  ;;  %v60_v53 = vld [vmem:[#allocation7 + $0xc] sm:$0x3]  ;;  %v1678_v61 = vld [vmem:[#allocation34_spill] sm:$0xff] }
 0x113   :  { %v530_v10 = vmul.f32 %v516_v16, %v1432_v12  ;;  %v531_v3 = vmul.f32 %v517_v21, %v1435_v14  ;;  %v775_v34 = vsub.f32 %v1674_v33, %v1369_v39  ;;  %v545_v37 = vadd.f32 %v529_v58, %v528_v59  ;;  %v1680_v21 = vld [vmem:[#allocation36_spill] sm:$0xff] }
 0x114   :  { %v261_v32 = vmul.f32 %v1432_v12, %v170_v54  ;;  %v262_v46 = vmul.f32 %v1435_v14, %v171_v24  ;;  %v504_v22 = vsub.f32 %v1675_v45, %v1335_v36  ;;  %v263_v27 = vmul.f32 %v1456_v48, %v172_v8  ;;  %v1681_v8 = vld [vmem:[#allocation37_spill] sm:$0xff] }
 0x115   :  { %816 = vadd.xlane.f32.xlu0 %v815_v55  ;;  %v264_v26 = vmul.f32 %v1459_v9, %v173_v0  ;;  %v505_v29 = vsub.f32 %v1676_v35, %v1335_v36  ;;  %v800_v13 = vmul.f32 %v786_v40, %v1432_v12  ;;  %v801_v23 = vmul.f32 %v787_v2, %v1435_v14 }
 0x116   :  { %546 = vadd.xlane.f32.xlu1 %v545_v37  ;;  %v788_v15 = vmul.f32 %v774_v63, %v774_v63  ;;  %v789_v47 = vmul.f32 %v775_v34, %v775_v34  ;;  %v548_v18 = vadd.f32 %v531_v3, %v530_v10  ;;  %v518_v57 = vmul.f32 %v504_v22, %v504_v22 }
 0x117   :  { %v506_v30 = vsub.f32 %v1677_v31, %v1335_v36  ;;  %v507_v19 = vsub.f32 %v1678_v61, %v1335_v36  ;;  %v279_v59 = vadd.f32 %v262_v46, %v261_v32  ;;  %v519_v16 = vmul.f32 %v505_v29, %v505_v29 }
 0x118   :  { %v160_v58 = vsub.f32 %v1679_v20, %v1347_v44  ;;  %v161_v49 = vsub.f32 %v1680_v21, %v1347_v44  ;;  %v1486_v11 = vrot.slane %v60_v53, %v1321_v56  ;;  %v1489_v5 = vrot.slane %v60_v53, %v1326_v7  ;;  %v1682_v7 = vld [vmem:[#allocation38_spill] sm:$0xff] }
 0x119   :  { %549 = vadd.xlane.f32.xlu0 %v548_v18  ;;  %v282_v6 = vadd.f32 %v264_v26, %v263_v27  ;;  %v818_v54 = vadd.f32 %v801_v23, %v800_v13  ;;  %v802_v24 = vmul.f32 %v788_v15, %v1456_v48  ;;  %v803_v43 = vmul.f32 %v789_v47, %v1459_v9 }
 0x11a   :  { %280 = vadd.xlane.f32.xlu1 %v279_v59  ;;  %v532_v1 = vmul.f32 %v518_v57, %v1456_v48  ;;  %v520_v17 = vmul.f32 %v506_v30, %v506_v30  ;;  %v521_v62 = vmul.f32 %v507_v19, %v507_v19  ;;  %v776_v0 = vsub.f32 %v1681_v8, %v1369_v39 }
 0x11b   :  { %v533_v56 = vmul.f32 %v519_v16, %v1459_v9  ;;  %v174_v40 = vmul.f32 %v160_v58, %v160_v58  ;;  %v175_v2 = vmul.f32 %v161_v49, %v161_v49  ;;  %v777_v4 = vsub.f32 %v1682_v7, %v1369_v39 }
 0x11c   :  { %v821_v63 = vadd.f32 %v803_v43, %v802_v24  ;;  %v534_v55 = vmul.f32 %v520_v17, %v1486_v11  ;;  %v535_v10 = vmul.f32 %v521_v62, %v1489_v5  ;;  %v790_v3 = vmul.f32 %v776_v0, %v776_v0 }
 0x11d   :  { %283 = vadd.xlane.f32.xlu0 %v282_v6  ;;  %v551_v33 = vadd.f32 %v533_v56, %v532_v1  ;;  %v265_v34 = vmul.f32 %v1486_v11, %v174_v40  ;;  %v266_v37 = vmul.f32 %v1489_v5, %v175_v2  ;;  %v791_v32 = vmul.f32 %v777_v4, %v777_v4 }
 0x11e   :  { %819 = vadd.xlane.f32.xlu1 %v818_v54  ;;  %v554_v46 = vadd.f32 %v535_v10, %v534_v55  ;;  %v804_v22 = vmul.f32 %v790_v3, %v1486_v11 }
 0x11f   :  { %v285_v45 = vadd.f32 %v266_v37, %v265_v34  ;;  %v805_v27 = vmul.f32 %v791_v32, %v1489_v5 }
 0x121   :  { %822 = vadd.xlane.f32.xlu0 %v821_v63  ;;  %v824_v26 = vadd.f32 %v805_v27, %v804_v22 }
 0x122   :  { %552 = vadd.xlane.f32.xlu1 %v551_v33 }
 0x125   :  { %555 = vadd.xlane.f32.xlu0 %v554_v46 }
 0x126   :  { %286 = vadd.xlane.f32.xlu1 %v285_v45 }
 0x12a   :  { %825 = vadd.xlane.f32.xlu1 %v824_v26 }
 0x18e   :  { %v272_v35 = vpop.xlane.xlu0 %271 }
 0x18f   :  { %v269_v29 = vpop.xlane.xlu1 %268  ;;  %v294_v23 = vrot.slane %v272_v35, 4 }
 0x190   :  { %v288_v15 = vrot.slane %v269_v29, 4 }
 0x191   :  { %v295_v31 = vadd.f32 %v294_v23, %v272_v35 }
 0x192   :  { %v541_v13 = vpop.xlane.xlu0 %540  ;;  %v289_v30 = vadd.f32 %v288_v15, %v269_v29 }
 0x193   :  { %v538_v47 = vpop.xlane.xlu1 %537  ;;  %v563_v53 = vrot.slane %v541_v13, 4  ;;  %v296_v21 = vrot.slane %v295_v31, 2 }
 0x194   :  { %v557_v18 = vrot.slane %v538_v47, 4  ;;  %v290_v49 = vrot.slane %v289_v30, 2 }
 0x195   :  { %v564_v59 = vadd.f32 %v563_v53, %v541_v13  ;;  %v297_v56 = vadd.f32 %v296_v21, %v295_v31 }
 0x196   :  { %v811_v57 = vpop.xlane.xlu0 %810  ;;  %v558_v20 = vadd.f32 %v557_v18, %v538_v47  ;;  %v291_v40 = vadd.f32 %v290_v49, %v289_v30 }
 0x197   :  { %v833_v61 = vrot.slane %v811_v57, 4  ;;  %v808_v19 = vpop.xlane.xlu1 %807  ;;  %v565_v43 = vrot.slane %v564_v59, 2  ;;  %v298_v46 = vrot.slane %v297_v56, 1 }
 0x198   :  { %v827_v16 = vrot.slane %v808_v19, 4  ;;  %v559_v62 = vrot.slane %v558_v20, 2  ;;  %v292_v45 = vrot.slane %v291_v40, 1 }
 0x199   :  { %v834_v6 = vadd.f32 %v833_v61, %v811_v57  ;;  %v566_v63 = vadd.f32 %v565_v43, %v564_v59  ;;  %v299_v30 = vadd.f32 %v298_v46, %v297_v56 }
 0x19a   :  { %v544_v58 = vpop.xlane.xlu0 %543  ;;  %v828_v1 = vadd.f32 %v827_v16, %v808_v19  ;;  %v560_v3 = vadd.f32 %v559_v62, %v558_v20  ;;  %v293_v61 = vadd.f32 %v292_v45, %v291_v40 }
 0x19b   :  { %v569_v54 = vrot.slane %v544_v58, 4  ;;  %v275_v24 = vpop.xlane.xlu1 %274  ;;  %v835_v2 = vrot.slane %v834_v6, 2  ;;  %v567_v26 = vrot.slane %v566_v63, 1 }
 0x19c   :  { %v300_v17 = vrot.slane %v275_v24, 4  ;;  %v829_v55 = vrot.slane %v828_v1, 2  ;;  %v561_v23 = vrot.slane %v560_v3, 1 }
 0x19d   :  { %v570_v8 = vadd.f32 %v569_v54, %v544_v58  ;;  %v836_v22 = vadd.f32 %v835_v2, %v834_v6  ;;  %v568_v20 = vadd.f32 %v567_v26, %v566_v63  ;;  %v330_v2 = vadd.f32 %v299_v30, %v293_v61 }
 0x19e   :  { %v278_v0 = vpop.xlane.xlu0 %277  ;;  %v301_v10 = vadd.f32 %v300_v17, %v275_v24  ;;  %v830_v35 = vadd.f32 %v829_v55, %v828_v1  ;;  %v562_v6 = vadd.f32 %v561_v23, %v560_v3 }
 0x19f   :  { %v306_v7 = vrot.slane %v278_v0, 4  ;;  %v814_v4 = vpop.xlane.xlu1 %813  ;;  %v571_v33 = vrot.slane %v570_v8, 2  ;;  %v837_v19 = vrot.slane %v836_v22, 1 }
 0x1a0   :  { %v839_v37 = vrot.slane %v814_v4, 4  ;;  %v302_v29 = vrot.slane %v301_v10, 2  ;;  %v831_v58 = vrot.slane %v830_v35, 1 }
 0x1a1   :  { %v307_v34 = vadd.f32 %v306_v7, %v278_v0  ;;  %v572_v47 = vadd.f32 %v571_v33, %v570_v8  ;;  %v838_v7 = vadd.f32 %v837_v19, %v836_v22 }
 0x1a2   :  { %v817_v32 = vpop.xlane.xlu0 %816  ;;  %v840_v18 = vadd.f32 %v839_v37, %v814_v4  ;;  %v303_v21 = vadd.f32 %v302_v29, %v301_v10  ;;  %v832_v55 = vadd.f32 %v831_v58, %v830_v35  ;;  %v599_v10 = vadd.f32 %v568_v20, %v562_v6 }
 0x1a3   :  { %v547_v27 = vpop.xlane.xlu1 %546  ;;  %v845_v15 = vrot.slane %v817_v32, 4  ;;  %v308_v53 = vrot.slane %v307_v34, 2  ;;  %v573_v1 = vrot.slane %v572_v47, 1 }
 0x1a4   :  { %v575_v13 = vrot.slane %v547_v27, 4  ;;  %v841_v62 = vrot.slane %v840_v18, 2  ;;  %v304_v33 = vrot.slane %v303_v21, 1 }
 0x1a5   :  { %v846_v54 = vadd.f32 %v845_v15, %v817_v32  ;;  %v309_v17 = vadd.f32 %v308_v53, %v307_v34  ;;  %v574_v45 = vadd.f32 %v573_v1, %v572_v47 }
 0x1a6   :  { %v576_v57 = vadd.f32 %v575_v13, %v547_v27  ;;  %v550_v31 = vpop.xlane.xlu0 %549  ;;  %v842_v26 = vadd.f32 %v841_v62, %v840_v18  ;;  %v305_v30 = vadd.f32 %v304_v33, %v303_v21 }
 0x1a7   :  { %v581_v59 = vrot.slane %v550_v31, 4  ;;  %v281_v16 = vpop.xlane.xlu1 %280  ;;  %v847_v46 = vrot.slane %v846_v54, 2  ;;  %v310_v27 = vrot.slane %v309_v17, 1 }
 0x1a8   :  { %v312_v49 = vrot.slane %v281_v16, 4  ;;  %v577_v24 = vrot.slane %v576_v57, 2  ;;  %v843_v47 = vrot.slane %v842_v26, 1 }
 0x1a9   :  { %v582_v43 = vadd.f32 %v581_v59, %v550_v31  ;;  %v869_v31 = vadd.f32 %v838_v7, %v832_v55  ;;  %v848_v19 = vadd.f32 %v847_v46, %v846_v54  ;;  %v311_v58 = vadd.f32 %v310_v27, %v309_v17 }
 0x1aa   :  { %v313_v8 = vadd.f32 %v312_v49, %v281_v16  ;;  %v284_v0 = vpop.xlane.xlu0 %283  ;;  %v578_v3 = vadd.f32 %v577_v24, %v576_v57  ;;  %v600_v57 = vadd.f32 %v599_v10, %v574_v45  ;;  %v844_v55 = vadd.f32 %v843_v47, %v842_v26 }
 0x1ab   :  { %v583_v56 = vrot.slane %v582_v43, 2  ;;  %v318_v40 = vrot.slane %v284_v0, 4  ;;  %v820_v4 = vpop.xlane.xlu1 %819 }
 0x1ac   :  { %v314_v63 = vrot.slane %v313_v8, 2  ;;  %v851_v37 = vrot.slane %v820_v4, 4  ;;  %v579_v59 = vrot.slane %v578_v3, 1 }
 0x1ad   :  { %v319_v32 = vadd.f32 %v318_v40, %v284_v0  ;;  %v584_v13 = vadd.f32 %v583_v56, %v582_v43  ;;  %v849_v56 = vrot.slane %v848_v19, 1 }
 0x1ae   :  { %v852_v34 = vadd.f32 %v851_v37, %v820_v4  ;;  %v823_v29 = vpop.xlane.xlu0 %822  ;;  %v315_v23 = vadd.f32 %v314_v63, %v313_v8  ;;  %v331_v8 = vadd.f32 %v330_v2, %v305_v30  ;;  %v580_v40 = vadd.f32 %v579_v59, %v578_v3 }
 0x1af   :  { %v320_v15 = vrot.slane %v319_v32, 2  ;;  %v857_v22 = vrot.slane %v823_v29, 4  ;;  %v553_v53 = vpop.xlane.xlu1 %552  ;;  %v585_v6 = vrot.slane %v584_v13, 1  ;;  %v870_v59 = vadd.f32 %v869_v31, %v844_v55 }
 0x1b0   :  { %v853_v35 = vrot.slane %v852_v34, 2  ;;  %v587_v61 = vrot.slane %v553_v53, 4  ;;  %v316_v24 = vrot.slane %v315_v23, 1  ;;  %v332_v37 = vadd.f32 %v331_v8, %v311_v58 }
 0x1b1   :  { %v321_v16 = vadd.f32 %v320_v15, %v319_v32  ;;  %v858_v20 = vadd.f32 %v857_v22, %v823_v29  ;;  %v586_v10 = vadd.f32 %v585_v6, %v584_v13  ;;  %v601_v22 = vadd.f32 %v600_v57, %v580_v40 }
 0x1b2   :  { %v588_v49 = vadd.f32 %v587_v61, %v553_v53  ;;  %v556_v18 = vpop.xlane.xlu0 %555  ;;  %v854_v0 = vadd.f32 %v853_v35, %v852_v34  ;;  %v317_v46 = vadd.f32 %v316_v24, %v315_v23  ;;  %v850_v34 = vadd.f32 %v849_v56, %v848_v19 }
 0x1b3   :  { %v859_v43 = vrot.slane %v858_v20, 2  ;;  %v593_v1 = vrot.slane %v556_v18, 4  ;;  %v287_v62 = vpop.xlane.xlu1 %286  ;;  %v322_v54 = vrot.slane %v321_v16, 1 }
 0x1b4   :  { %v589_v7 = vrot.slane %v588_v49, 2  ;;  %v324_v21 = vrot.slane %v287_v62, 4  ;;  %v855_v27 = vrot.slane %v854_v0, 1  ;;  %v333_v58 = vadd.f32 %v332_v37, %v317_v46 }
 0x1b5   :  { %v594_v4 = vadd.f32 %v593_v1, %v556_v18  ;;  %v860_v33 = vadd.f32 %v859_v43, %v858_v20  ;;  %v323_v53 = vadd.f32 %v322_v54, %v321_v16  ;;  %v602_v20 = vadd.f32 %v601_v22, %v586_v10 }
 0x1b6   :  { %v590_v63 = vadd.f32 %v589_v7, %v588_v49  ;;  %v325_v17 = vadd.f32 %v324_v21, %v287_v62  ;;  %v856_v13 = vadd.f32 %v855_v27, %v854_v0  ;;  %v871_v18 = vadd.f32 %v870_v59, %v850_v34 }
 0x1b7   :  { %v595_v32 = vrot.slane %v594_v4, 2  ;;  %v826_v45 = vpop.xlane.xlu1 %825  ;;  %v861_v3 = vrot.slane %v860_v33, 1  ;;  %v334_v43 = vadd.f32 %v333_v58, %v323_v53  ;;  %v615_v53 = vstv %s970_s21 }
 0x1b8   :  { %v591_v29 = vrot.slane %v590_v63, 1  ;;  %v326_v15 = vrot.slane %v325_v17, 2  ;;  %v863_v2 = vrot.slane %v826_v45, 4  ;;  %v872_v62 = vadd.f32 %v871_v18, %v856_v13  ;;  %v997_v18 = vld [vmem:[#allocation6 + $0x78] sm:$0xff] }
 0x1b9   :  { %v596_v30 = vadd.f32 %v595_v32, %v594_v4  ;;  %v862_v1 = vadd.f32 %v861_v3, %v860_v33  ;;  %v885_v58 = vstv %s1512_s25 }
 0x1ba   :  { %v592_v35 = vadd.f32 %v591_v29, %v590_v63  ;;  %v327_v61 = vadd.f32 %v326_v15, %v325_v17  ;;  %v864_v26 = vadd.f32 %v863_v2, %v826_v45 }
 0x1bb   :  { %v597_v47 = vrot.slane %v596_v30, 1  ;;  %v873_v31 = vadd.f32 %v872_v62, %v862_v1  ;;  %v999_v1 = vld [vmem:[#allocation6 + $0x88] sm:$0xff]  ;;  %v1001_v62 = vld [vmem:[#allocation6 + $0x98] sm:$0xff] }
 0x1bc   :  { %v328_v23 = vrot.slane %v327_v61, 1  ;;  %v865_v49 = vrot.slane %v864_v26, 2  ;;  %v603_v6 = vadd.f32 %v602_v20, %v592_v35  ;;  %v351_v20 = vstv %s1510_s24 }
 0x1bd   :  { %v598_v24 = vadd.f32 %v597_v47, %v596_v30  ;;  %v346_v30 = vstv %s337_s22 }
 0x1be   :  { %v329_v19 = vadd.f32 %v328_v23, %v327_v61  ;;  %v866_v57 = vadd.f32 %v865_v49, %v864_v26  ;;  %v620_v26 = vstv %s1508_s23  ;;  %v996_v23 = vld [vmem:[#allocation6 + $0x70] sm:$0xff] }
 0x1bf   :  { %v604_v16 = vadd.f32 %v603_v6, %v598_v24  ;;  %v998_v24 = vld [vmem:[#allocation6 + $0x80] sm:$0xff] }
 0x1c0   :  { %v335_v8 = vadd.f32 %v334_v43, %v329_v19  ;;  %v867_v7 = vrot.slane %v866_v57, 1 }
 0x1c1   :  { %v605_v21 = vmul.f32 %v1323_v38, %v604_v16 }
 0x1c2   :  { %v336_v56 = vmul.f32 %v1323_v38, %v335_v8  ;;  %v868_v40 = vadd.f32 %v867_v7, %v866_v57  ;;  %v1000_v57 = vld [vmem:[#allocation6 + $0x90] sm:$0xff]  ;;  %v1002_v7 = vld [vmem:[#allocation6 + $0xa0] sm:$0xff] }
 0x1c3   :  { %v607_v0 = vadd.f32 1e-05, %v605_v21 }
 0x1c4   :  { %v338_v54 = vadd.f32 1e-05, %v336_v56  ;;  %v874_v4 = vadd.f32 %v873_v31, %v868_v40  ;;  %v1003_v56 = vld [vmem:[#allocation6 + $0xa8] sm:$0xff] }
 0x1c5   :  { %984 = vrsqrt.f32 %v607_v0  ;;  %vm610_vm0 = vcmp.eq.f32.partialorder %v607_v0, inf  ;;  %v613_v10 = vand.u32 2147483648, %v607_v0  ;;  %vm612_vm1 = vcmp.eq.f32.partialorder %v607_v0, 0.0 }
 0x1c6   :  { %986 = vrsqrt.f32 %v338_v54  ;;  %v875_v55 = vmul.f32 %v1323_v38, %v874_v4  ;;  %vm341_vm2 = vcmp.eq.f32.partialorder %v338_v54, inf  ;;  %v344_v45 = vand.u32 2147483648, %v338_v54 }
 0x1c7   :  { %vm343_vm3 = vcmp.eq.f32.partialorder %v338_v54, 0.0 }
 0x1c8   :  { %v877_v33 = vadd.f32 1e-05, %v875_v55  ;;  %v1006_v55 = vld [vmem:[#allocation6 + $0xc0] sm:$0xff] }
 0x1ca   :  { %988 = vrsqrt.f32 %v877_v33  ;;  %vm880_vm4 = vcmp.eq.f32.partialorder %v877_v33, inf  ;;  %v883_v22 = vand.u32 2147483648, %v877_v33  ;;  %vm882_vm5 = vcmp.eq.f32.partialorder %v877_v33, 0.0 }
 0x1cf   :  { %v985_v63 = vpop.eup %984 }
 0x1d0   :  { %v987_v17 = vpop.eup %986  ;;  %v609_v37 = vmul.f32 %v985_v63, %v607_v0  ;;  %v1007_v63 = vld [vmem:[#allocation6 + $0xc8] sm:$0xff] }
 0x1d1   :  { %v340_v46 = vmul.f32 %v987_v17, %v338_v54 }
 0x1d2   :  { %v611_v32 = vsel %vm610_vm0, %v607_v0, %v609_v37  ;;  %v1004_v0 = vld [vmem:[#allocation6 + $0xb0] sm:$0xff] }
 0x1d3   :  { %v614_v27 = vsel %vm612_vm1, %v613_v10, %v611_v32  ;;  %v342_v29 = vsel %vm341_vm2, %v338_v54, %v340_v46  ;;  %v1008_v37 = vld [vmem:[#allocation6 + $0xd0] sm:$0xff]  ;;  %v1009_v46 = vld [vmem:[#allocation6 + $0xd8] sm:$0xff] }
 0x1d4   :  { %990 = vrcp.f32 %v614_v27  ;;  %v345_v15 = vsel %vm343_vm3, %v344_v45, %v342_v29  ;;  %v989_v2 = vpop.eup %988 }
 0x1d5   :  { %992 = vrcp.f32 %v345_v15  ;;  %v879_v38 = vmul.f32 %v989_v2, %v877_v33 }
 0x1d7   :  { %v881_v34 = vsel %vm880_vm4, %v877_v33, %v879_v38 }
 0x1d8   :  { %v884_v3 = vsel %vm882_vm5, %v883_v22, %v881_v34 }
 0x1d9   :  { %994 = vrcp.f32 %v884_v3 }
 0x1de   :  { %v991_v35 = vpop.eup %990 }
 0x1df   :  { %v993_v61 = vpop.eup %992  ;;  %v617_v59 = vmul.f32 %v991_v35, %v615_v53 }
 0x1e0   :  { %v1516_v47 = vmul.f32 %v993_v61, %v346_v30 }
 0x1e1   :  { %v619_v13 = vmul.f32 %v617_v59, %v1335_v36  ;;  %v622_v49 = vmul.f32 %v996_v23, %v617_v59  ;;  %v623_v6 = vmul.f32 %v997_v18, %v617_v59  ;;  %v624_v43 = vmul.f32 %v998_v24, %v617_v59  ;;  %v1005_v36 = vld [vmem:[#allocation6 + $0xb8] sm:$0xff] }
 0x1e2   :  { %v625_v19 = vmul.f32 %v999_v1, %v617_v59  ;;  %v626_v16 = vmul.f32 %v1000_v57, %v617_v59  ;;  %v627_v8 = vmul.f32 %v1001_v62, %v617_v59  ;;  %v628_v21 = vmul.f32 %v1002_v7, %v617_v59 }
 0x1e3   :  { %v621_v31 = vsub.f32 %v620_v26, %v619_v13  ;;  %v629_v40 = vmul.f32 %v1003_v56, %v617_v59  ;;  %v630_v54 = vmul.f32 %v1004_v0, %v617_v59  ;;  %v631_v4 = vmul.f32 %v1005_v36, %v617_v59  ;;  %v1526_v24 = vpop.eup %994 }
 0x1e4   :  { %v632_v33 = vmul.f32 %v1006_v55, %v617_v59  ;;  %v633_v17 = vmul.f32 %v1007_v63, %v617_v59  ;;  %v634_v10 = vmul.f32 %v1008_v37, %v617_v59  ;;  %v635_v32 = vmul.f32 %v1009_v46, %v617_v59  ;;  %v1015_v63 = vld [vmem:[#allocation6 + $0x28] sm:$0xff]  ;;  %v1016_v37 = vld [vmem:[#allocation6 + $0x30] sm:$0xff] }
 0x1e5   :  { %v636_v45 = vadd.f32 %v622_v49, %v621_v31  ;;  %v637_v27 = vadd.f32 %v623_v6, %v621_v31  ;;  %v638_v29 = vadd.f32 %v624_v43, %v621_v31  ;;  %v639_v15 = vadd.f32 %v625_v19, %v621_v31 }
 0x1e6   :  { %v640_v2 = vadd.f32 %v626_v16, %v621_v31  ;;  %v641_v38 = vadd.f32 %v627_v8, %v621_v31  ;;  %v642_v34 = vadd.f32 %v628_v21, %v621_v31  ;;  %v643_v22 = vadd.f32 %v629_v40, %v621_v31  ;;  %v1011_v40 = vld [vmem:[#allocation6 + $0x8] sm:$0xff] }
 0x1e7   :  { %v644_v53 = vadd.f32 %v630_v54, %v621_v31  ;;  %v645_v30 = vadd.f32 %v631_v4, %v621_v31  ;;  %v646_v3 = vadd.f32 %v632_v33, %v621_v31  ;;  %v647_v35 = vadd.f32 %v633_v17, %v621_v31  ;;  %v1012_v54 = vld [vmem:[#allocation6 + $0x10] sm:$0xff]  ;;  %v1013_v4 = vld [vmem:[#allocation6 + $0x18] sm:$0xff]  ;;  %v1014_v33 = vld [vmem:[#allocation6 + $0x20] sm:$0xff] }
 0x1e8   :  { %v648_v61 = vadd.f32 %v634_v10, %v621_v31  ;;  %v649_v26 = vadd.f32 %v635_v32, %v621_v31  ;;  %v650_v13 = vmul.f32 %v636_v45, %v1338_v25  ;;  %v651_v23 = vmul.f32 %v637_v27, %v1341_v52  ;;  %v1010_v31 = vld [vmem:[#allocation6] sm:$0xff]  ;;  %v1017_v32 = vld [vmem:[#allocation6 + $0x38] sm:$0xff] }
 0x1e9   :  { %v652_v59 = vmul.f32 %v638_v29, %v1329_v60  ;;  %v653_v49 = vmul.f32 %v639_v15, %v1332_v28  ;;  %v654_v18 = vmul.f32 %v640_v2, %v1344_v50  ;;  %v655_v6 = vmul.f32 %v641_v38, %v1350_v41  ;;  %v1018_v27 = vld [vmem:[#allocation6 + $0x40] sm:$0xff]  ;;  %v1019_v15 = vld [vmem:[#allocation6 + $0x48] sm:$0xff]  ;;  %v1020_v38 = vld [vmem:[#allocation6 + $0x50] sm:$0xff] }
 0x1ea   :  { %v656_v43 = vmul.f32 %v642_v34, %v1377_v42  ;;  %v657_v1 = vmul.f32 %v643_v22, %v1408_v51  ;;  %v658_v19 = vmul.f32 %v644_v53, %v1432_v12  ;;  %v659_v57 = vmul.f32 %v645_v30, %v1435_v14  ;;  %665 = vst [vmem:[#allocation9 + $0x10] sm:$0xff] %v650_v13  ;;  %v1021_v22 = vld [vmem:[#allocation6 + $0x58] sm:$0xff]  ;;  %v1022_v30 = vld [vmem:[#allocation6 + $0x60] sm:$0xff] }
 0x1eb   :  { %666 = vst [vmem:[#allocation9 + $0x18] sm:$0xff] %v651_v23  ;;  %v660_v16 = vmul.f32 %v646_v3, %v1456_v48  ;;  %v661_v62 = vmul.f32 %v647_v35, %v1459_v9  ;;  %v662_v8 = vmul.f32 %v648_v61, %v1486_v11  ;;  %v663_v7 = vmul.f32 %v649_v26, %v1489_v5  ;;  %v1023_v35 = vld [vmem:[#allocation6 + $0x68] sm:$0xff] }
 0x1ec   :  { %667 = vst [vmem:[#allocation9 + $0x40] sm:$0xff] %v652_v59  ;;  %668 = vst [vmem:[#allocation9 + $0x48] sm:$0xff] %v653_v49  ;;  %v350_v21 = vmul.f32 %v1516_v47, %v1347_v44  ;;  %v353_v56 = vmul.f32 %v1010_v31, %v1516_v47  ;;  %v354_v0 = vmul.f32 %v1011_v40, %v1516_v47 }
 0x1ed   :  { %669 = vst [vmem:[#allocation9 + $0x70] sm:$0xff] %v654_v18  ;;  %670 = vst [vmem:[#allocation9 + $0x78] sm:$0xff] %v655_v6  ;;  %v355_v36 = vmul.f32 %v1012_v54, %v1516_v47  ;;  %v356_v55 = vmul.f32 %v1013_v4, %v1516_v47  ;;  %v357_v44 = vmul.f32 %v1014_v33, %v1516_v47 }
 0x1ee   :  { %671 = vst [vmem:[#allocation9 + $0xa0] sm:$0xff] %v656_v43  ;;  %672 = vst [vmem:[#allocation9 + $0xa8] sm:$0xff] %v657_v1  ;;  %v358_v17 = vmul.f32 %v1015_v63, %v1516_v47  ;;  %v359_v10 = vmul.f32 %v1016_v37, %v1516_v47  ;;  %v352_v46 = vsub.f32 %v351_v20, %v350_v21 }
 0x1ef   :  { %673 = vst [vmem:[#allocation9 + $0xd0] sm:$0xff] %v658_v19  ;;  %674 = vst [vmem:[#allocation9 + $0xd8] sm:$0xff] %v659_v57  ;;  %v360_v45 = vmul.f32 %v1017_v32, %v1516_v47  ;;  %v361_v29 = vmul.f32 %v1018_v27, %v1516_v47  ;;  %v362_v2 = vmul.f32 %v1019_v15, %v1516_v47  ;;  %v1025_v32 = vld [vmem:[#allocation6 + $0xe8] sm:$0xff]  ;;  %v1026_v27 = vld [vmem:[#allocation6 + $0xf0] sm:$0xff] }
 0x1f0   :  { %675 = vst [vmem:[#allocation9 + $0x100] sm:$0xff] %v660_v16  ;;  %676 = vst [vmem:[#allocation9 + $0x108] sm:$0xff] %v661_v62  ;;  %v363_v34 = vmul.f32 %v1020_v38, %v1516_v47  ;;  %v364_v53 = vmul.f32 %v1021_v22, %v1516_v47  ;;  %v365_v3 = vmul.f32 %v1022_v30, %v1516_v47  ;;  %v1027_v15 = vld [vmem:[#allocation6 + $0xf8] sm:$0xff]  ;;  %v1028_v38 = vld [vmem:[#allocation6 + $0x100] sm:$0xff] }
 0x1f1   :  { %677 = vst [vmem:[#allocation9 + $0x130] sm:$0xff] %v662_v8  ;;  %678 = vst [vmem:[#allocation9 + $0x138] sm:$0xff] %v663_v7  ;;  %v366_v20 = vmul.f32 %v1023_v35, %v1516_v47  ;;  %v367_v61 = vadd.f32 %v353_v56, %v352_v46  ;;  %v368_v26 = vadd.f32 %v354_v0, %v352_v46  ;;  %v1029_v22 = vld [vmem:[#allocation6 + $0x108] sm:$0xff] }
 0x1f2   :  { %v369_v13 = vadd.f32 %v355_v36, %v352_v46  ;;  %v370_v23 = vadd.f32 %v356_v55, %v352_v46  ;;  %v371_v59 = vadd.f32 %v357_v44, %v352_v46  ;;  %v372_v49 = vadd.f32 %v358_v17, %v352_v46 }
 0x1f3   :  { %v373_v18 = vadd.f32 %v359_v10, %v352_v46  ;;  %v374_v6 = vadd.f32 %v360_v45, %v352_v46  ;;  %v375_v43 = vadd.f32 %v361_v29, %v352_v46  ;;  %v376_v1 = vadd.f32 %v362_v2, %v352_v46  ;;  %v1024_v10 = vld [vmem:[#allocation6 + $0xe0] sm:$0xff] }
 0x1f4   :  { %v377_v19 = vadd.f32 %v363_v34, %v352_v46  ;;  %v378_v57 = vadd.f32 %v364_v53, %v352_v46  ;;  %v379_v16 = vadd.f32 %v365_v3, %v352_v46  ;;  %v380_v62 = vadd.f32 %v366_v20, %v352_v46  ;;  %v1031_v3 = vld [vmem:[#allocation6 + $0x118] sm:$0xff]  ;;  %v1032_v20 = vld [vmem:[#allocation6 + $0x120] sm:$0xff] }
 0x1f5   :  { %v381_v8 = vmul.f32 %v367_v61, %v1338_v25  ;;  %v382_v47 = vmul.f32 %v368_v26, %v1341_v52  ;;  %v383_v7 = vmul.f32 %v369_v13, %v1329_v60  ;;  %v384_v21 = vmul.f32 %v370_v23, %v1332_v28  ;;  %v1034_v13 = vld [vmem:[#allocation6 + $0x130] sm:$0xff] }
 0x1f6   :  { %v385_v31 = vmul.f32 %v371_v59, %v1344_v50  ;;  %v386_v56 = vmul.f32 %v372_v49, %v1350_v41  ;;  %v387_v40 = vmul.f32 %v373_v18, %v1377_v42  ;;  %v388_v0 = vmul.f32 %v374_v6, %v1408_v51  ;;  %v1035_v59 = vld [vmem:[#allocation6 + $0x138] sm:$0xff]  ;;  %v1036_v18 = vld [vmem:[#allocation6 + $0x140] sm:$0xff] }
 0x1f7   :  { %v389_v54 = vmul.f32 %v375_v43, %v1432_v12  ;;  %v390_v36 = vmul.f32 %v376_v1, %v1435_v14  ;;  %395 = vst [vmem:[#allocation9] sm:$0xff] %v381_v8  ;;  %396 = vst [vmem:[#allocation9 + $0x8] sm:$0xff] %v382_v47  ;;  %v391_v4 = vmul.f32 %v377_v19, %v1456_v48  ;;  %v890_v17 = vstv %s1554_s26  ;;  %v1037_v43 = vld [vmem:[#allocation6 + $0x148] sm:$0xff] }
 0x1f8   :  { %v392_v55 = vmul.f32 %v378_v57, %v1459_v9  ;;  %v393_v33 = vmul.f32 %v379_v16, %v1486_v11  ;;  %v394_v44 = vmul.f32 %v380_v62, %v1489_v5  ;;  %397 = vst [vmem:[#allocation9 + $0x30] sm:$0xff] %v383_v7  ;;  %398 = vst [vmem:[#allocation9 + $0x38] sm:$0xff] %v384_v21 }
 0x1f9   :  { %399 = vst [vmem:[#allocation9 + $0x60] sm:$0xff] %v385_v31  ;;  %400 = vst [vmem:[#allocation9 + $0x68] sm:$0xff] %v386_v56  ;;  %v887_v63 = vmul.f32 %v1526_v24, %v885_v58  ;;  %v1030_v58 = vld [vmem:[#allocation6 + $0x110] sm:$0xff] }
 0x1fa   :  { %401 = vst [vmem:[#allocation9 + $0x90] sm:$0xff] %v387_v40  ;;  %402 = vst [vmem:[#allocation9 + $0x98] sm:$0xff] %v388_v0 }
 0x1fb   :  { %403 = vst [vmem:[#allocation9 + $0xc0] sm:$0xff] %v389_v54  ;;  %404 = vst [vmem:[#allocation9 + $0xc8] sm:$0xff] %v390_v36  ;;  %v889_v37 = vmul.f32 %v887_v63, %v1369_v39  ;;  %v892_v46 = vmul.f32 %v1024_v10, %v887_v63  ;;  %v893_v45 = vmul.f32 %v1025_v32, %v887_v63  ;;  %v1033_v39 = vld [vmem:[#allocation6 + $0x128] sm:$0xff] }
 0x1fc   :  { %405 = vst [vmem:[#allocation9 + $0xf0] sm:$0xff] %v391_v4  ;;  %406 = vst [vmem:[#allocation9 + $0xf8] sm:$0xff] %v392_v55  ;;  %v894_v29 = vmul.f32 %v1026_v27, %v887_v63  ;;  %v895_v2 = vmul.f32 %v1027_v15, %v887_v63  ;;  %v896_v34 = vmul.f32 %v1028_v38, %v887_v63 }
 0x1fd   :  { %407 = vst [vmem:[#allocation9 + $0x120] sm:$0xff] %v393_v33  ;;  %408 = vst [vmem:[#allocation9 + $0x128] sm:$0xff] %v394_v44  ;;  %v897_v53 = vmul.f32 %v1029_v22, %v887_v63  ;;  %v898_v24 = vmul.f32 %v1030_v58, %v887_v63  ;;  %v891_v30 = vsub.f32 %v890_v17, %v889_v37 }
 0x1fe   :  { %v899_v35 = vmul.f32 %v1031_v3, %v887_v63  ;;  %v900_v61 = vmul.f32 %v1032_v20, %v887_v63  ;;  %v901_v26 = vmul.f32 %v1033_v39, %v887_v63  ;;  %v902_v23 = vmul.f32 %v1034_v13, %v887_v63 }
 0x1ff   :  { %v903_v49 = vmul.f32 %v1035_v59, %v887_v63  ;;  %v904_v6 = vmul.f32 %v1036_v18, %v887_v63  ;;  %v905_v1 = vmul.f32 %v1037_v43, %v887_v63  ;;  %v906_v19 = vadd.f32 %v892_v46, %v891_v30 }
 0x200   :  { %v907_v57 = vadd.f32 %v893_v45, %v891_v30  ;;  %v908_v16 = vadd.f32 %v894_v29, %v891_v30  ;;  %v909_v62 = vadd.f32 %v895_v2, %v891_v30  ;;  %v910_v8 = vadd.f32 %v896_v34, %v891_v30 }
 0x201   :  { %v911_v47 = vadd.f32 %v897_v53, %v891_v30  ;;  %v912_v7 = vadd.f32 %v898_v24, %v891_v30  ;;  %v913_v21 = vadd.f32 %v899_v35, %v891_v30  ;;  %v914_v31 = vadd.f32 %v900_v61, %v891_v30 }
 0x202   :  { %v915_v56 = vadd.f32 %v901_v26, %v891_v30  ;;  %v916_v40 = vadd.f32 %v902_v23, %v891_v30  ;;  %v917_v0 = vadd.f32 %v903_v49, %v891_v30  ;;  %v918_v54 = vadd.f32 %v904_v6, %v891_v30 }
 0x203   :  { %v919_v36 = vadd.f32 %v905_v1, %v891_v30  ;;  %v920_v4 = vmul.f32 %v906_v19, %v1338_v25  ;;  %v921_v55 = vmul.f32 %v907_v57, %v1341_v52  ;;  %v922_v33 = vmul.f32 %v908_v16, %v1329_v60 }
 0x204   :  { %v923_v44 = vmul.f32 %v909_v62, %v1332_v28  ;;  %v924_v63 = vmul.f32 %v910_v8, %v1344_v50  ;;  %v925_v17 = vmul.f32 %v911_v47, %v1350_v41  ;;  %v926_v37 = vmul.f32 %v912_v7, %v1377_v42 }
 0x205   :  { %v927_v10 = vmul.f32 %v913_v21, %v1408_v51  ;;  %v928_v46 = vmul.f32 %v914_v31, %v1432_v12  ;;  %v929_v25 = vmul.f32 %v915_v56, %v1435_v14  ;;  %935 = vst [vmem:[#allocation9 + $0x20] sm:$0xff] %v920_v4  ;;  %936 = vst [vmem:[#allocation9 + $0x28] sm:$0xff] %v921_v55 }
 0x206   :  { %v930_v52 = vmul.f32 %v916_v40, %v1456_v48  ;;  %v931_v60 = vmul.f32 %v917_v0, %v1459_v9  ;;  %v932_v28 = vmul.f32 %v918_v54, %v1486_v11  ;;  %v933_v50 = vmul.f32 %v919_v36, %v1489_v5  ;;  %937 = vst [vmem:[#allocation9 + $0x50] sm:$0xff] %v922_v33 }
 0x207   :  { %938 = vst [vmem:[#allocation9 + $0x58] sm:$0xff] %v923_v44  ;;  %939 = vst [vmem:[#allocation9 + $0x80] sm:$0xff] %v924_v63 }
 0x208   :  { %940 = vst [vmem:[#allocation9 + $0x88] sm:$0xff] %v925_v17  ;;  %941 = vst [vmem:[#allocation9 + $0xb0] sm:$0xff] %v926_v37 }
 0x209   :  { %942 = vst [vmem:[#allocation9 + $0xb8] sm:$0xff] %v927_v10  ;;  %943 = vst [vmem:[#allocation9 + $0xe0] sm:$0xff] %v928_v46 }
 0x20a   :  { %944 = vst [vmem:[#allocation9 + $0xe8] sm:$0xff] %v929_v25  ;;  %945 = vst [vmem:[#allocation9 + $0x110] sm:$0xff] %v930_v52 }
 0x20b   :  { %946 = vst [vmem:[#allocation9 + $0x118] sm:$0xff] %v931_v60  ;;  %947 = vst [vmem:[#allocation9 + $0x140] sm:$0xff] %v932_v28 }
 0x20c   :  { %948 = vst [vmem:[#allocation9 + $0x148] sm:$0xff] %v933_v50 }
 0x20d   :  { %1103 = shalt.err (!%p1100_p9)
}
 0x20e   :  { %s1104_s6 = scalar_lea.hbm %s1607_s3, 5376 }
 0x20f   :  { %p1105_p10 = scmp.ne.s32.totalorder %s1607_s3, %s1104_s6  ;;  %p1108_p11 = scmp.lt.u32.totalorder %s1104_s6, %s1607_s3 }
 0x211   :  { %p1110_p12 = pnand %p1108_p11, %p1105_p10 }
 0x213   :  { %1113 = shalt.err (!%p1110_p12)
}
 0x214   :  { %960 = dma.vmem_to_hbm [thread:$0]  %s955_s28, 5376, %s1607_s3, [#allocation4], %s1124_s0, %s1124_s0, %s1125_s5  }
 0x215   :  { %1120 = dma.done.wait [#allocation4], 5376  }
 0x216   :  { %1121 = vsyncadd [#allocation4], 4294961920 }
 0x217   :  { %964 = vsyncpa [#allocation3], 1 }
 0x218   :  { %965 = vsyncpa [#allocation8], 1 }
 0x219   :  { %966 = vsyncpa [#allocation4], 1 }
 0x21a   :  { %967 = vsyncpa [#allocation5], 1 }

</bundles_post_ra>
